<compile_context>
chip_gen: v5e
topology: v5e:2x2
jax: 0.10.0
libtpu: 0.0.40
codegen_flags: <defaults>
</compile_context>

<pallas_src>
import functools

import jax
import jax.numpy as jnp
from jax.experimental import pallas as pl
from jax.experimental.pallas import tpu as pltpu

# Module hyperparameters (from the PyTorch script)
HIDDEN_SIZE = 5
INPUT_SIZE = 1
NUM_CLASSES = 1
NUM_LAYERS = 1
TIME_STEP = 10

GP = 128          # lanes per gate group (one vreg lane width)
NG = 4 * GP       # fused gate width: [i | f | o | g], each in its own group
OUT_PAD = 128     # lane-dense output width (class c at lane c)


def lstm_fc_kernel(x_ref, p_ref, out_ref, *, T, B, I, H, C):
    """Single-layer LSTM (batch_first) + fc on the final hidden state.

    x_ref   : (T, B, I)  time-major input, fp32.
    p_ref   : (I+H+C+2, NG) packed params, lane-aligned per gate
              (gate order along lane groups: [i, f, o, g], payload in lanes
               0..H-1 of each group, zero padded):
                rows [0, I)           W_ih
                rows [I, I+H)         W_hh
                row  I+H              b_ih + b_hh
                rows [I+H+1, I+H+1+C) W_fc   (class weights at lanes 0..H-1)
                row  I+H+1+C          b_fc   (class c bias at lane c)
    out_ref : (B, OUT_PAD)  class c at lane c; lanes >= C are zero.
    """
    xt = x_ref[...]                                             # (T, B, I)
    P = p_ref[...]                                              # (R, NG)

    # Prologue-only parameter slices (hoisted out of the recurrence).
    w_ih_rows = [P[i:i + 1, :] for i in range(I)]               # (1, NG) each
    w_hh_rows = [P[I + k:I + k + 1, :] for k in range(H)]       # (1, NG) each
    bias = P[I + H:I + H + 1, :]                                # (1, NG)
    wfc_rows = [P[I + H + 1 + c:I + H + 2 + c, 0:GP] for c in range(C)]
    bfc = P[I + H + 1 + C:I + H + 2 + C, 0:OUT_PAD]             # (1, OUT_PAD)

    # h/c live in one lane group; lanes >= H stay exactly 0 because the padded
    # weight/bias lanes are 0 (sigmoid(0)*tanh(0) contributions vanish).
    h = jnp.zeros((B, GP), jnp.float32)
    c = jnp.zeros((B, GP), jnp.float32)

    # Fully unrolled recurrence (T is a small compile-time constant).
    for t in range(T):
        # Input contribution: VPU outer product (no MXU for K=I=1), plus bias.
        # No h dependence -> overlaps with the previous step's nonlinearities.
        pre = bias
        for i in range(I):
            pre = pre + xt[t, :, i:i + 1] * w_ih_rows[i]        # (B,1)*(1,NG)

        # Recurrent contribution: VPU broadcast-MAC over the H rows of W_hh
        # (keeps the serial critical path off the MXU entirely).
        rec = pre
        for k in range(H):
            rec = rec + h[:, k:k + 1] * w_hh_rows[k]            # (B,1)*(1,NG)

        sig = jax.nn.sigmoid(rec[:, :3 * GP])   # [i | f | o] — one EUP slab
        g_g = jnp.tanh(rec[:, 3 * GP:])         # g
        i_g = sig[:, 0 * GP:1 * GP]
        f_g = sig[:, 1 * GP:2 * GP]
        o_g = sig[:, 2 * GP:3 * GP]
        c = f_g * c + i_g * g_g
        h = o_g * jnp.tanh(c)

    # fc tail on the VPU: per-class multiply + lane reduce, lane-dense store.
    lane = jax.lax.broadcasted_iota(jnp.int32, (B, OUT_PAD), 1)
    out = jnp.zeros((B, OUT_PAD), jnp.float32)
    for cc in range(C):
        val = jnp.sum(h * wfc_rows[cc], axis=-1, keepdims=True)  # (B, 1)
        out = jnp.where(lane == cc, val, out)
    out_ref[...] = out + bfc


def pack_params(raw_params):
    """One-time repack of raw PyTorch-shaped weights into the kernel layout.

    Raw (PyTorch) layout: W_ih (4H, I), W_hh (4H, H), b_ih (4H,), b_hh (4H,)
    with gate row order [i, f, g, o]; W_fc (C, H), b_fc (C,).
    Kernel layout: single (I+H+C+2, NG) fp32 buffer, gate lane-group order
    [i, f, o, g], each gate padded to its own 128-lane group.
    """
    w_ih_pt, w_hh_pt, b_ih, b_hh, w_fc_pt, b_fc_pt = raw_params
    I = w_ih_pt.shape[1]
    H = w_hh_pt.shape[1]
    C = w_fc_pt.shape[0]
    slot_to_pt = (0, 1, 3, 2)   # kernel slots [i, f, o, g] <- PyTorch [i, f, g, o]

    def pack_gates(w_pt, in_dim):            # (4H, in_dim) -> (in_dim, NG)
        w = w_pt.astype(jnp.float32).reshape(4, H, in_dim)
        out = jnp.zeros((in_dim, NG), jnp.float32)
        for slot, g in enumerate(slot_to_pt):
            out = out.at[:, slot * GP:slot * GP + H].set(w[g].T)
        return out

    w_ih_p = pack_gates(w_ih_pt, I)                              # (I, NG)
    w_hh_p = pack_gates(w_hh_pt, H)                              # (H, NG)
    b = (b_ih + b_hh).astype(jnp.float32).reshape(4, H)
    b_p = jnp.zeros((1, NG), jnp.float32)
    for slot, g in enumerate(slot_to_pt):
        b_p = b_p.at[0, slot * GP:slot * GP + H].set(b[g])
    wfc_p = jnp.zeros((C, NG), jnp.float32).at[:, :H].set(w_fc_pt.astype(jnp.float32))
    bfc_p = jnp.zeros((1, NG), jnp.float32).at[0, :C].set(b_fc_pt.astype(jnp.float32))
    return jnp.concatenate([w_ih_p, w_hh_p, b_p, wfc_p, bfc_p], axis=0)


def lstm_forward(x, packed_params, *, hidden_size=HIDDEN_SIZE,
                 num_classes=NUM_CLASSES):
    """x: (B, T, I) batch_first fp32; packed_params from pack_params().
    Returns (B, num_classes)."""
    B, T, I = x.shape
    H, C = hidden_size, num_classes
    assert packed_params.shape == (I + H + C + 2, NG)

    # Time-major view so the per-step gx slab is indexed on the untiled
    # leading axis (no sublane-straddling slices from B=4 row windows).
    x_tm = jnp.transpose(x, (1, 0, 2)).astype(jnp.float32)       # (T, B, I)

    vmem = pl.BlockSpec(memory_space=pltpu.MemorySpace.VMEM)
    kernel = functools.partial(lstm_fc_kernel, T=T, B=B, I=I, H=H, C=C)

    # Gridless single-TC call: total footprint is tiny, so adding a grid over
    # B (or a 2-core split on v7x) only adds per-step pipeline overhead.
    out_padded = pl.pallas_call(
        kernel,
        out_shape=jax.ShapeDtypeStruct((B, OUT_PAD), jnp.float32),
        in_specs=[vmem, vmem],
        out_specs=vmem,
    )(x_tm, packed_params)
    return out_padded[:, :C]


def init_params_pytorch(key, input_size, hidden_size, num_classes):
    """Raw weights with exact PyTorch nn.LSTM / nn.Linear shapes & gate order.

    nn.LSTM:  weight_ih_l0 (4H, I), weight_hh_l0 (4H, H), bias_ih_l0 (4H,),
              bias_hh_l0 (4H,)  — gate row order [i, f, g, o].
    nn.Linear: weight (C, H), bias (C,).
    Init: U(-1/sqrt(H), 1/sqrt(H)).
    """
    H, I, C = hidden_size, input_size, num_classes
    k = 1.0 / jnp.sqrt(jnp.float32(H))
    ks = jax.random.split(key, 6)
    w_ih = jax.random.uniform(ks[0], (4 * H, I), jnp.float32, -k, k)
    w_hh = jax.random.uniform(ks[1], (4 * H, H), jnp.float32, -k, k)
    b_ih = jax.random.uniform(ks[2], (4 * H,), jnp.float32, -k, k)
    b_hh = jax.random.uniform(ks[3], (4 * H,), jnp.float32, -k, k)
    w_fc = jax.random.uniform(ks[4], (C, H), jnp.float32, -k, k)
    b_fc = jax.random.uniform(ks[5], (C,), jnp.float32, -k, k)
    return (w_ih, w_hh, b_ih, b_hh, w_fc, b_fc)


def lstm_forward_ref(x, raw_params):
    """Pure-JAX reference with torch.nn.LSTM(batch_first) + Linear semantics,
    consuming the RAW PyTorch-shaped weights (gate order [i, f, g, o])."""
    w_ih, w_hh, b_ih, b_hh, w_fc, b_fc = raw_params
    B, T, I = x.shape
    H = w_hh.shape[1]
    h = jnp.zeros((B, H), jnp.float32)
    c = jnp.zeros((B, H), jnp.float32)
    for t in range(T):
        gates = x[:, t, :] @ w_ih.T + b_ih + h @ w_hh.T + b_hh   # (B, 4H)
        i_g = jax.nn.sigmoid(gates[:, 0:H])
        f_g = jax.nn.sigmoid(gates[:, H:2 * H])
        g_g = jnp.tanh(gates[:, 2 * H:3 * H])
        o_g = jax.nn.sigmoid(gates[:, 3 * H:4 * H])
        c = f_g * c + i_g * g_g
        h = o_g * jnp.tanh(c)
    return h @ w_fc.T + b_fc


if __name__ == "__main__":
    key = jax.random.PRNGKey(0)
    k_x, k_p = jax.random.split(key)

    batch = 4
    x = jax.random.normal(k_x, (batch, TIME_STEP, INPUT_SIZE), jnp.float32)
    raw_params = init_params_pytorch(k_p, INPUT_SIZE, HIDDEN_SIZE, NUM_CLASSES)

    # One-time repack (in a real model this happens at parameter-load time).
    packed = pack_params(raw_params)

    out = lstm_forward(x, packed)
    out = jax.block_until_ready(out)

    ref = lstm_forward_ref(x, raw_params)
    assert out.shape == (batch, NUM_CLASSES)
    assert jnp.allclose(out, ref, atol=1e-5, rtol=1e-5), (out, ref)

    print("KERNEL_OK")
</pallas_src>

<mosaic_0001>
module attributes {stable_mosaic.version = 11 : i64} {
  func.func @lstm_fc_kernel(%arg0: memref<10x4x1xf32, #tpu.memory_space<vmem>>, %arg1: memref<9x512xf32, #tpu.memory_space<vmem>>, %arg2: memref<4x128xf32, #tpu.memory_space<vmem>>) attributes {dimension_semantics = [], scalar_prefetch = 0 : i64, scratch_operands = 0 : i64, tpu.core_type = #tpu.core_type<tc>} {
    %c0 = arith.constant 0 : index
    %c0_0 = arith.constant 0 : index
    %c0_1 = arith.constant 0 : index
    %0 = vector.load %arg0[%c0, %c0_0, %c0_1] : memref<10x4x1xf32, #tpu.memory_space<vmem>>, vector<10x4x1xf32>
    %c0_2 = arith.constant 0 : index
    %c0_3 = arith.constant 0 : index
    %1 = vector.load %arg1[%c0_2, %c0_3] : memref<9x512xf32, #tpu.memory_space<vmem>>, vector<9x512xf32>
    %2 = vector.extract_strided_slice %1 {offsets = [0, 0], sizes = [1, 512], strides = [1, 1]} : vector<9x512xf32> to vector<1x512xf32>
    %3 = vector.extract_strided_slice %1 {offsets = [1, 0], sizes = [1, 512], strides = [1, 1]} : vector<9x512xf32> to vector<1x512xf32>
    %4 = vector.extract_strided_slice %1 {offsets = [2, 0], sizes = [1, 512], strides = [1, 1]} : vector<9x512xf32> to vector<1x512xf32>
    %5 = vector.extract_strided_slice %1 {offsets = [3, 0], sizes = [1, 512], strides = [1, 1]} : vector<9x512xf32> to vector<1x512xf32>
    %6 = vector.extract_strided_slice %1 {offsets = [4, 0], sizes = [1, 512], strides = [1, 1]} : vector<9x512xf32> to vector<1x512xf32>
    %7 = vector.extract_strided_slice %1 {offsets = [5, 0], sizes = [1, 512], strides = [1, 1]} : vector<9x512xf32> to vector<1x512xf32>
    %8 = vector.extract_strided_slice %1 {offsets = [6, 0], sizes = [1, 512], strides = [1, 1]} : vector<9x512xf32> to vector<1x512xf32>
    %9 = vector.extract_strided_slice %1 {offsets = [7, 0], sizes = [1, 128], strides = [1, 1]} : vector<9x512xf32> to vector<1x128xf32>
    %10 = vector.extract_strided_slice %1 {offsets = [8, 0], sizes = [1, 128], strides = [1, 1]} : vector<9x512xf32> to vector<1x128xf32>
    %cst = arith.constant 0.000000e+00 : f32
    %11 = vector.broadcast %cst : f32 to vector<4x128xf32>
    %cst_4 = arith.constant 0.000000e+00 : f32
    %12 = vector.broadcast %cst_4 : f32 to vector<4x128xf32>
    %13 = vector.extract_strided_slice %0 {offsets = [0, 0, 0], sizes = [1, 4, 1], strides = [1, 1, 1]} : vector<10x4x1xf32> to vector<1x4x1xf32>
    %14 = vector.shape_cast %13 : vector<1x4x1xf32> to vector<4x1xf32>
    %15 = vector.broadcast %14 : vector<4x1xf32> to vector<4x512xf32>
    %16 = vector.broadcast %2 : vector<1x512xf32> to vector<4x512xf32>
    %17 = arith.mulf %15, %16 : vector<4x512xf32>
    %18 = vector.broadcast %8 : vector<1x512xf32> to vector<4x512xf32>
    %19 = arith.addf %18, %17 : vector<4x512xf32>
    %20 = vector.extract_strided_slice %11 {offsets = [0, 0], sizes = [4, 1], strides = [1, 1]} : vector<4x128xf32> to vector<4x1xf32>
    %21 = vector.broadcast %20 : vector<4x1xf32> to vector<4x512xf32>
    %22 = vector.broadcast %3 : vector<1x512xf32> to vector<4x512xf32>
    %23 = arith.mulf %21, %22 : vector<4x512xf32>
    %24 = arith.addf %19, %23 : vector<4x512xf32>
    %25 = vector.extract_strided_slice %11 {offsets = [0, 1], sizes = [4, 1], strides = [1, 1]} : vector<4x128xf32> to vector<4x1xf32>
    %26 = vector.broadcast %25 : vector<4x1xf32> to vector<4x512xf32>
    %27 = vector.broadcast %4 : vector<1x512xf32> to vector<4x512xf32>
    %28 = arith.mulf %26, %27 : vector<4x512xf32>
    %29 = arith.addf %24, %28 : vector<4x512xf32>
    %30 = vector.extract_strided_slice %11 {offsets = [0, 2], sizes = [4, 1], strides = [1, 1]} : vector<4x128xf32> to vector<4x1xf32>
    %31 = vector.broadcast %30 : vector<4x1xf32> to vector<4x512xf32>
    %32 = vector.broadcast %5 : vector<1x512xf32> to vector<4x512xf32>
    %33 = arith.mulf %31, %32 : vector<4x512xf32>
    %34 = arith.addf %29, %33 : vector<4x512xf32>
    %35 = vector.extract_strided_slice %11 {offsets = [0, 3], sizes = [4, 1], strides = [1, 1]} : vector<4x128xf32> to vector<4x1xf32>
    %36 = vector.broadcast %35 : vector<4x1xf32> to vector<4x512xf32>
    %37 = vector.broadcast %6 : vector<1x512xf32> to vector<4x512xf32>
    %38 = arith.mulf %36, %37 : vector<4x512xf32>
    %39 = arith.addf %34, %38 : vector<4x512xf32>
    %40 = vector.extract_strided_slice %11 {offsets = [0, 4], sizes = [4, 1], strides = [1, 1]} : vector<4x128xf32> to vector<4x1xf32>
    %41 = vector.broadcast %40 : vector<4x1xf32> to vector<4x512xf32>
    %42 = vector.broadcast %7 : vector<1x512xf32> to vector<4x512xf32>
    %43 = arith.mulf %41, %42 : vector<4x512xf32>
    %44 = arith.addf %39, %43 : vector<4x512xf32>
    %45 = vector.extract_strided_slice %44 {offsets = [0, 0], sizes = [4, 384], strides = [1, 1]} : vector<4x512xf32> to vector<4x384xf32>
    %46 = arith.negf %45 : vector<4x384xf32>
    %47 = math.exp %46 : vector<4x384xf32>
    %cst_5 = arith.constant 1.000000e+00 : f32
    %48 = vector.broadcast %cst_5 : f32 to vector<4x384xf32>
    %49 = arith.addf %48, %47 : vector<4x384xf32>
    %50 = arith.divf %48, %49 : vector<4x384xf32>
    %51 = vector.extract_strided_slice %44 {offsets = [0, 384], sizes = [4, 128], strides = [1, 1]} : vector<4x512xf32> to vector<4x128xf32>
    %52 = math.tanh %51 : vector<4x128xf32>
    %53 = vector.extract_strided_slice %50 {offsets = [0, 0], sizes = [4, 128], strides = [1, 1]} : vector<4x384xf32> to vector<4x128xf32>
    %54 = vector.extract_strided_slice %50 {offsets = [0, 128], sizes = [4, 128], strides = [1, 1]} : vector<4x384xf32> to vector<4x128xf32>
    %55 = vector.extract_strided_slice %50 {offsets = [0, 256], sizes = [4, 128], strides = [1, 1]} : vector<4x384xf32> to vector<4x128xf32>
    %56 = arith.mulf %54, %12 : vector<4x128xf32>
    %57 = arith.mulf %53, %52 : vector<4x128xf32>
    %58 = arith.addf %56, %57 : vector<4x128xf32>
    %59 = math.tanh %58 : vector<4x128xf32>
    %60 = arith.mulf %55, %59 : vector<4x128xf32>
    %61 = vector.extract_strided_slice %0 {offsets = [1, 0, 0], sizes = [1, 4, 1], strides = [1, 1, 1]} : vector<10x4x1xf32> to vector<1x4x1xf32>
    %62 = vector.shape_cast %61 : vector<1x4x1xf32> to vector<4x1xf32>
    %63 = vector.broadcast %62 : vector<4x1xf32> to vector<4x512xf32>
    %64 = vector.broadcast %2 : vector<1x512xf32> to vector<4x512xf32>
    %65 = arith.mulf %63, %64 : vector<4x512xf32>
    %66 = vector.broadcast %8 : vector<1x512xf32> to vector<4x512xf32>
    %67 = arith.addf %66, %65 : vector<4x512xf32>
    %68 = vector.extract_strided_slice %60 {offsets = [0, 0], sizes = [4, 1], strides = [1, 1]} : vector<4x128xf32> to vector<4x1xf32>
    %69 = vector.broadcast %68 : vector<4x1xf32> to vector<4x512xf32>
    %70 = vector.broadcast %3 : vector<1x512xf32> to vector<4x512xf32>
    %71 = arith.mulf %69, %70 : vector<4x512xf32>
    %72 = arith.addf %67, %71 : vector<4x512xf32>
    %73 = vector.extract_strided_slice %60 {offsets = [0, 1], sizes = [4, 1], strides = [1, 1]} : vector<4x128xf32> to vector<4x1xf32>
    %74 = vector.broadcast %73 : vector<4x1xf32> to vector<4x512xf32>
    %75 = vector.broadcast %4 : vector<1x512xf32> to vector<4x512xf32>
    %76 = arith.mulf %74, %75 : vector<4x512xf32>
    %77 = arith.addf %72, %76 : vector<4x512xf32>
    %78 = vector.extract_strided_slice %60 {offsets = [0, 2], sizes = [4, 1], strides = [1, 1]} : vector<4x128xf32> to vector<4x1xf32>
    %79 = vector.broadcast %78 : vector<4x1xf32> to vector<4x512xf32>
    %80 = vector.broadcast %5 : vector<1x512xf32> to vector<4x512xf32>
    %81 = arith.mulf %79, %80 : vector<4x512xf32>
    %82 = arith.addf %77, %81 : vector<4x512xf32>
    %83 = vector.extract_strided_slice %60 {offsets = [0, 3], sizes = [4, 1], strides = [1, 1]} : vector<4x128xf32> to vector<4x1xf32>
    %84 = vector.broadcast %83 : vector<4x1xf32> to vector<4x512xf32>
    %85 = vector.broadcast %6 : vector<1x512xf32> to vector<4x512xf32>
    %86 = arith.mulf %84, %85 : vector<4x512xf32>
    %87 = arith.addf %82, %86 : vector<4x512xf32>
    %88 = vector.extract_strided_slice %60 {offsets = [0, 4], sizes = [4, 1], strides = [1, 1]} : vector<4x128xf32> to vector<4x1xf32>
    %89 = vector.broadcast %88 : vector<4x1xf32> to vector<4x512xf32>
    %90 = vector.broadcast %7 : vector<1x512xf32> to vector<4x512xf32>
    %91 = arith.mulf %89, %90 : vector<4x512xf32>
    %92 = arith.addf %87, %91 : vector<4x512xf32>
    %93 = vector.extract_strided_slice %92 {offsets = [0, 0], sizes = [4, 384], strides = [1, 1]} : vector<4x512xf32> to vector<4x384xf32>
    %94 = arith.negf %93 : vector<4x384xf32>
    %95 = math.exp %94 : vector<4x384xf32>
    %cst_6 = arith.constant 1.000000e+00 : f32
    %96 = vector.broadcast %cst_6 : f32 to vector<4x384xf32>
    %97 = arith.addf %96, %95 : vector<4x384xf32>
    %98 = arith.divf %96, %97 : vector<4x384xf32>
    %99 = vector.extract_strided_slice %92 {offsets = [0, 384], sizes = [4, 128], strides = [1, 1]} : vector<4x512xf32> to vector<4x128xf32>
    %100 = math.tanh %99 : vector<4x128xf32>
    %101 = vector.extract_strided_slice %98 {offsets = [0, 0], sizes = [4, 128], strides = [1, 1]} : vector<4x384xf32> to vector<4x128xf32>
    %102 = vector.extract_strided_slice %98 {offsets = [0, 128], sizes = [4, 128], strides = [1, 1]} : vector<4x384xf32> to vector<4x128xf32>
    %103 = vector.extract_strided_slice %98 {offsets = [0, 256], sizes = [4, 128], strides = [1, 1]} : vector<4x384xf32> to vector<4x128xf32>
    %104 = arith.mulf %102, %58 : vector<4x128xf32>
    %105 = arith.mulf %101, %100 : vector<4x128xf32>
    %106 = arith.addf %104, %105 : vector<4x128xf32>
    %107 = math.tanh %106 : vector<4x128xf32>
    %108 = arith.mulf %103, %107 : vector<4x128xf32>
    %109 = vector.extract_strided_slice %0 {offsets = [2, 0, 0], sizes = [1, 4, 1], strides = [1, 1, 1]} : vector<10x4x1xf32> to vector<1x4x1xf32>
    %110 = vector.shape_cast %109 : vector<1x4x1xf32> to vector<4x1xf32>
    %111 = vector.broadcast %110 : vector<4x1xf32> to vector<4x512xf32>
    %112 = vector.broadcast %2 : vector<1x512xf32> to vector<4x512xf32>
    %113 = arith.mulf %111, %112 : vector<4x512xf32>
    %114 = vector.broadcast %8 : vector<1x512xf32> to vector<4x512xf32>
    %115 = arith.addf %114, %113 : vector<4x512xf32>
    %116 = vector.extract_strided_slice %108 {offsets = [0, 0], sizes = [4, 1], strides = [1, 1]} : vector<4x128xf32> to vector<4x1xf32>
    %117 = vector.broadcast %116 : vector<4x1xf32> to vector<4x512xf32>
    %118 = vector.broadcast %3 : vector<1x512xf32> to vector<4x512xf32>
    %119 = arith.mulf %117, %118 : vector<4x512xf32>
    %120 = arith.addf %115, %119 : vector<4x512xf32>
    %121 = vector.extract_strided_slice %108 {offsets = [0, 1], sizes = [4, 1], strides = [1, 1]} : vector<4x128xf32> to vector<4x1xf32>
    %122 = vector.broadcast %121 : vector<4x1xf32> to vector<4x512xf32>
    %123 = vector.broadcast %4 : vector<1x512xf32> to vector<4x512xf32>
    %124 = arith.mulf %122, %123 : vector<4x512xf32>
    %125 = arith.addf %120, %124 : vector<4x512xf32>
    %126 = vector.extract_strided_slice %108 {offsets = [0, 2], sizes = [4, 1], strides = [1, 1]} : vector<4x128xf32> to vector<4x1xf32>
    %127 = vector.broadcast %126 : vector<4x1xf32> to vector<4x512xf32>
    %128 = vector.broadcast %5 : vector<1x512xf32> to vector<4x512xf32>
    %129 = arith.mulf %127, %128 : vector<4x512xf32>
    %130 = arith.addf %125, %129 : vector<4x512xf32>
    %131 = vector.extract_strided_slice %108 {offsets = [0, 3], sizes = [4, 1], strides = [1, 1]} : vector<4x128xf32> to vector<4x1xf32>
    %132 = vector.broadcast %131 : vector<4x1xf32> to vector<4x512xf32>
    %133 = vector.broadcast %6 : vector<1x512xf32> to vector<4x512xf32>
    %134 = arith.mulf %132, %133 : vector<4x512xf32>
    %135 = arith.addf %130, %134 : vector<4x512xf32>
    %136 = vector.extract_strided_slice %108 {offsets = [0, 4], sizes = [4, 1], strides = [1, 1]} : vector<4x128xf32> to vector<4x1xf32>
    %137 = vector.broadcast %136 : vector<4x1xf32> to vector<4x512xf32>
    %138 = vector.broadcast %7 : vector<1x512xf32> to vector<4x512xf32>
    %139 = arith.mulf %137, %138 : vector<4x512xf32>
    %140 = arith.addf %135, %139 : vector<4x512xf32>
    %141 = vector.extract_strided_slice %140 {offsets = [0, 0], sizes = [4, 384], strides = [1, 1]} : vector<4x512xf32> to vector<4x384xf32>
    %142 = arith.negf %141 : vector<4x384xf32>
    %143 = math.exp %142 : vector<4x384xf32>
    %cst_7 = arith.constant 1.000000e+00 : f32
    %144 = vector.broadcast %cst_7 : f32 to vector<4x384xf32>
    %145 = arith.addf %144, %143 : vector<4x384xf32>
    %146 = arith.divf %144, %145 : vector<4x384xf32>
    %147 = vector.extract_strided_slice %140 {offsets = [0, 384], sizes = [4, 128], strides = [1, 1]} : vector<4x512xf32> to vector<4x128xf32>
    %148 = math.tanh %147 : vector<4x128xf32>
    %149 = vector.extract_strided_slice %146 {offsets = [0, 0], sizes = [4, 128], strides = [1, 1]} : vector<4x384xf32> to vector<4x128xf32>
    %150 = vector.extract_strided_slice %146 {offsets = [0, 128], sizes = [4, 128], strides = [1, 1]} : vector<4x384xf32> to vector<4x128xf32>
    %151 = vector.extract_strided_slice %146 {offsets = [0, 256], sizes = [4, 128], strides = [1, 1]} : vector<4x384xf32> to vector<4x128xf32>
    %152 = arith.mulf %150, %106 : vector<4x128xf32>
    %153 = arith.mulf %149, %148 : vector<4x128xf32>
    %154 = arith.addf %152, %153 : vector<4x128xf32>
    %155 = math.tanh %154 : vector<4x128xf32>
    %156 = arith.mulf %151, %155 : vector<4x128xf32>
    %157 = vector.extract_strided_slice %0 {offsets = [3, 0, 0], sizes = [1, 4, 1], strides = [1, 1, 1]} : vector<10x4x1xf32> to vector<1x4x1xf32>
    %158 = vector.shape_cast %157 : vector<1x4x1xf32> to vector<4x1xf32>
    %159 = vector.broadcast %158 : vector<4x1xf32> to vector<4x512xf32>
    %160 = vector.broadcast %2 : vector<1x512xf32> to vector<4x512xf32>
    %161 = arith.mulf %159, %160 : vector<4x512xf32>
    %162 = vector.broadcast %8 : vector<1x512xf32> to vector<4x512xf32>
    %163 = arith.addf %162, %161 : vector<4x512xf32>
    %164 = vector.extract_strided_slice %156 {offsets = [0, 0], sizes = [4, 1], strides = [1, 1]} : vector<4x128xf32> to vector<4x1xf32>
    %165 = vector.broadcast %164 : vector<4x1xf32> to vector<4x512xf32>
    %166 = vector.broadcast %3 : vector<1x512xf32> to vector<4x512xf32>
    %167 = arith.mulf %165, %166 : vector<4x512xf32>
    %168 = arith.addf %163, %167 : vector<4x512xf32>
    %169 = vector.extract_strided_slice %156 {offsets = [0, 1], sizes = [4, 1], strides = [1, 1]} : vector<4x128xf32> to vector<4x1xf32>
    %170 = vector.broadcast %169 : vector<4x1xf32> to vector<4x512xf32>
    %171 = vector.broadcast %4 : vector<1x512xf32> to vector<4x512xf32>
    %172 = arith.mulf %170, %171 : vector<4x512xf32>
    %173 = arith.addf %168, %172 : vector<4x512xf32>
    %174 = vector.extract_strided_slice %156 {offsets = [0, 2], sizes = [4, 1], strides = [1, 1]} : vector<4x128xf32> to vector<4x1xf32>
    %175 = vector.broadcast %174 : vector<4x1xf32> to vector<4x512xf32>
    %176 = vector.broadcast %5 : vector<1x512xf32> to vector<4x512xf32>
    %177 = arith.mulf %175, %176 : vector<4x512xf32>
    %178 = arith.addf %173, %177 : vector<4x512xf32>
    %179 = vector.extract_strided_slice %156 {offsets = [0, 3], sizes = [4, 1], strides = [1, 1]} : vector<4x128xf32> to vector<4x1xf32>
    %180 = vector.broadcast %179 : vector<4x1xf32> to vector<4x512xf32>
    %181 = vector.broadcast %6 : vector<1x512xf32> to vector<4x512xf32>
    %182 = arith.mulf %180, %181 : vector<4x512xf32>
    %183 = arith.addf %178, %182 : vector<4x512xf32>
    %184 = vector.extract_strided_slice %156 {offsets = [0, 4], sizes = [4, 1], strides = [1, 1]} : vector<4x128xf32> to vector<4x1xf32>
    %185 = vector.broadcast %184 : vector<4x1xf32> to vector<4x512xf32>
    %186 = vector.broadcast %7 : vector<1x512xf32> to vector<4x512xf32>
    %187 = arith.mulf %185, %186 : vector<4x512xf32>
    %188 = arith.addf %183, %187 : vector<4x512xf32>
    %189 = vector.extract_strided_slice %188 {offsets = [0, 0], sizes = [4, 384], strides = [1, 1]} : vector<4x512xf32> to vector<4x384xf32>
    %190 = arith.negf %189 : vector<4x384xf32>
    %191 = math.exp %190 : vector<4x384xf32>
    %cst_8 = arith.constant 1.000000e+00 : f32
    %192 = vector.broadcast %cst_8 : f32 to vector<4x384xf32>
    %193 = arith.addf %192, %191 : vector<4x384xf32>
    %194 = arith.divf %192, %193 : vector<4x384xf32>
    %195 = vector.extract_strided_slice %188 {offsets = [0, 384], sizes = [4, 128], strides = [1, 1]} : vector<4x512xf32> to vector<4x128xf32>
    %196 = math.tanh %195 : vector<4x128xf32>
    %197 = vector.extract_strided_slice %194 {offsets = [0, 0], sizes = [4, 128], strides = [1, 1]} : vector<4x384xf32> to vector<4x128xf32>
    %198 = vector.extract_strided_slice %194 {offsets = [0, 128], sizes = [4, 128], strides = [1, 1]} : vector<4x384xf32> to vector<4x128xf32>
    %199 = vector.extract_strided_slice %194 {offsets = [0, 256], sizes = [4, 128], strides = [1, 1]} : vector<4x384xf32> to vector<4x128xf32>
    %200 = arith.mulf %198, %154 : vector<4x128xf32>
    %201 = arith.mulf %197, %196 : vector<4x128xf32>
    %202 = arith.addf %200, %201 : vector<4x128xf32>
    %203 = math.tanh %202 : vector<4x128xf32>
    %204 = arith.mulf %199, %203 : vector<4x128xf32>
    %205 = vector.extract_strided_slice %0 {offsets = [4, 0, 0], sizes = [1, 4, 1], strides = [1, 1, 1]} : vector<10x4x1xf32> to vector<1x4x1xf32>
    %206 = vector.shape_cast %205 : vector<1x4x1xf32> to vector<4x1xf32>
    %207 = vector.broadcast %206 : vector<4x1xf32> to vector<4x512xf32>
    %208 = vector.broadcast %2 : vector<1x512xf32> to vector<4x512xf32>
    %209 = arith.mulf %207, %208 : vector<4x512xf32>
    %210 = vector.broadcast %8 : vector<1x512xf32> to vector<4x512xf32>
    %211 = arith.addf %210, %209 : vector<4x512xf32>
    %212 = vector.extract_strided_slice %204 {offsets = [0, 0], sizes = [4, 1], strides = [1, 1]} : vector<4x128xf32> to vector<4x1xf32>
    %213 = vector.broadcast %212 : vector<4x1xf32> to vector<4x512xf32>
    %214 = vector.broadcast %3 : vector<1x512xf32> to vector<4x512xf32>
    %215 = arith.mulf %213, %214 : vector<4x512xf32>
    %216 = arith.addf %211, %215 : vector<4x512xf32>
    %217 = vector.extract_strided_slice %204 {offsets = [0, 1], sizes = [4, 1], strides = [1, 1]} : vector<4x128xf32> to vector<4x1xf32>
    %218 = vector.broadcast %217 : vector<4x1xf32> to vector<4x512xf32>
    %219 = vector.broadcast %4 : vector<1x512xf32> to vector<4x512xf32>
    %220 = arith.mulf %218, %219 : vector<4x512xf32>
    %221 = arith.addf %216, %220 : vector<4x512xf32>
    %222 = vector.extract_strided_slice %204 {offsets = [0, 2], sizes = [4, 1], strides = [1, 1]} : vector<4x128xf32> to vector<4x1xf32>
    %223 = vector.broadcast %222 : vector<4x1xf32> to vector<4x512xf32>
    %224 = vector.broadcast %5 : vector<1x512xf32> to vector<4x512xf32>
    %225 = arith.mulf %223, %224 : vector<4x512xf32>
    %226 = arith.addf %221, %225 : vector<4x512xf32>
    %227 = vector.extract_strided_slice %204 {offsets = [0, 3], sizes = [4, 1], strides = [1, 1]} : vector<4x128xf32> to vector<4x1xf32>
    %228 = vector.broadcast %227 : vector<4x1xf32> to vector<4x512xf32>
    %229 = vector.broadcast %6 : vector<1x512xf32> to vector<4x512xf32>
    %230 = arith.mulf %228, %229 : vector<4x512xf32>
    %231 = arith.addf %226, %230 : vector<4x512xf32>
    %232 = vector.extract_strided_slice %204 {offsets = [0, 4], sizes = [4, 1], strides = [1, 1]} : vector<4x128xf32> to vector<4x1xf32>
    %233 = vector.broadcast %232 : vector<4x1xf32> to vector<4x512xf32>
    %234 = vector.broadcast %7 : vector<1x512xf32> to vector<4x512xf32>
    %235 = arith.mulf %233, %234 : vector<4x512xf32>
    %236 = arith.addf %231, %235 : vector<4x512xf32>
    %237 = vector.extract_strided_slice %236 {offsets = [0, 0], sizes = [4, 384], strides = [1, 1]} : vector<4x512xf32> to vector<4x384xf32>
    %238 = arith.negf %237 : vector<4x384xf32>
    %239 = math.exp %238 : vector<4x384xf32>
    %cst_9 = arith.constant 1.000000e+00 : f32
    %240 = vector.broadcast %cst_9 : f32 to vector<4x384xf32>
    %241 = arith.addf %240, %239 : vector<4x384xf32>
    %242 = arith.divf %240, %241 : vector<4x384xf32>
    %243 = vector.extract_strided_slice %236 {offsets = [0, 384], sizes = [4, 128], strides = [1, 1]} : vector<4x512xf32> to vector<4x128xf32>
    %244 = math.tanh %243 : vector<4x128xf32>
    %245 = vector.extract_strided_slice %242 {offsets = [0, 0], sizes = [4, 128], strides = [1, 1]} : vector<4x384xf32> to vector<4x128xf32>
    %246 = vector.extract_strided_slice %242 {offsets = [0, 128], sizes = [4, 128], strides = [1, 1]} : vector<4x384xf32> to vector<4x128xf32>
    %247 = vector.extract_strided_slice %242 {offsets = [0, 256], sizes = [4, 128], strides = [1, 1]} : vector<4x384xf32> to vector<4x128xf32>
    %248 = arith.mulf %246, %202 : vector<4x128xf32>
    %249 = arith.mulf %245, %244 : vector<4x128xf32>
    %250 = arith.addf %248, %249 : vector<4x128xf32>
    %251 = math.tanh %250 : vector<4x128xf32>
    %252 = arith.mulf %247, %251 : vector<4x128xf32>
    %253 = vector.extract_strided_slice %0 {offsets = [5, 0, 0], sizes = [1, 4, 1], strides = [1, 1, 1]} : vector<10x4x1xf32> to vector<1x4x1xf32>
    %254 = vector.shape_cast %253 : vector<1x4x1xf32> to vector<4x1xf32>
    %255 = vector.broadcast %254 : vector<4x1xf32> to vector<4x512xf32>
    %256 = vector.broadcast %2 : vector<1x512xf32> to vector<4x512xf32>
    %257 = arith.mulf %255, %256 : vector<4x512xf32>
    %258 = vector.broadcast %8 : vector<1x512xf32> to vector<4x512xf32>
    %259 = arith.addf %258, %257 : vector<4x512xf32>
    %260 = vector.extract_strided_slice %252 {offsets = [0, 0], sizes = [4, 1], strides = [1, 1]} : vector<4x128xf32> to vector<4x1xf32>
    %261 = vector.broadcast %260 : vector<4x1xf32> to vector<4x512xf32>
    %262 = vector.broadcast %3 : vector<1x512xf32> to vector<4x512xf32>
    %263 = arith.mulf %261, %262 : vector<4x512xf32>
    %264 = arith.addf %259, %263 : vector<4x512xf32>
    %265 = vector.extract_strided_slice %252 {offsets = [0, 1], sizes = [4, 1], strides = [1, 1]} : vector<4x128xf32> to vector<4x1xf32>
    %266 = vector.broadcast %265 : vector<4x1xf32> to vector<4x512xf32>
    %267 = vector.broadcast %4 : vector<1x512xf32> to vector<4x512xf32>
    %268 = arith.mulf %266, %267 : vector<4x512xf32>
    %269 = arith.addf %264, %268 : vector<4x512xf32>
    %270 = vector.extract_strided_slice %252 {offsets = [0, 2], sizes = [4, 1], strides = [1, 1]} : vector<4x128xf32> to vector<4x1xf32>
    %271 = vector.broadcast %270 : vector<4x1xf32> to vector<4x512xf32>
    %272 = vector.broadcast %5 : vector<1x512xf32> to vector<4x512xf32>
    %273 = arith.mulf %271, %272 : vector<4x512xf32>
    %274 = arith.addf %269, %273 : vector<4x512xf32>
    %275 = vector.extract_strided_slice %252 {offsets = [0, 3], sizes = [4, 1], strides = [1, 1]} : vector<4x128xf32> to vector<4x1xf32>
    %276 = vector.broadcast %275 : vector<4x1xf32> to vector<4x512xf32>
    %277 = vector.broadcast %6 : vector<1x512xf32> to vector<4x512xf32>
    %278 = arith.mulf %276, %277 : vector<4x512xf32>
    %279 = arith.addf %274, %278 : vector<4x512xf32>
    %280 = vector.extract_strided_slice %252 {offsets = [0, 4], sizes = [4, 1], strides = [1, 1]} : vector<4x128xf32> to vector<4x1xf32>
    %281 = vector.broadcast %280 : vector<4x1xf32> to vector<4x512xf32>
    %282 = vector.broadcast %7 : vector<1x512xf32> to vector<4x512xf32>
    %283 = arith.mulf %281, %282 : vector<4x512xf32>
    %284 = arith.addf %279, %283 : vector<4x512xf32>
    %285 = vector.extract_strided_slice %284 {offsets = [0, 0], sizes = [4, 384], strides = [1, 1]} : vector<4x512xf32> to vector<4x384xf32>
    %286 = arith.negf %285 : vector<4x384xf32>
    %287 = math.exp %286 : vector<4x384xf32>
    %cst_10 = arith.constant 1.000000e+00 : f32
    %288 = vector.broadcast %cst_10 : f32 to vector<4x384xf32>
    %289 = arith.addf %288, %287 : vector<4x384xf32>
    %290 = arith.divf %288, %289 : vector<4x384xf32>
    %291 = vector.extract_strided_slice %284 {offsets = [0, 384], sizes = [4, 128], strides = [1, 1]} : vector<4x512xf32> to vector<4x128xf32>
    %292 = math.tanh %291 : vector<4x128xf32>
    %293 = vector.extract_strided_slice %290 {offsets = [0, 0], sizes = [4, 128], strides = [1, 1]} : vector<4x384xf32> to vector<4x128xf32>
    %294 = vector.extract_strided_slice %290 {offsets = [0, 128], sizes = [4, 128], strides = [1, 1]} : vector<4x384xf32> to vector<4x128xf32>
    %295 = vector.extract_strided_slice %290 {offsets = [0, 256], sizes = [4, 128], strides = [1, 1]} : vector<4x384xf32> to vector<4x128xf32>
    %296 = arith.mulf %294, %250 : vector<4x128xf32>
    %297 = arith.mulf %293, %292 : vector<4x128xf32>
    %298 = arith.addf %296, %297 : vector<4x128xf32>
    %299 = math.tanh %298 : vector<4x128xf32>
    %300 = arith.mulf %295, %299 : vector<4x128xf32>
    %301 = vector.extract_strided_slice %0 {offsets = [6, 0, 0], sizes = [1, 4, 1], strides = [1, 1, 1]} : vector<10x4x1xf32> to vector<1x4x1xf32>
    %302 = vector.shape_cast %301 : vector<1x4x1xf32> to vector<4x1xf32>
    %303 = vector.broadcast %302 : vector<4x1xf32> to vector<4x512xf32>
    %304 = vector.broadcast %2 : vector<1x512xf32> to vector<4x512xf32>
    %305 = arith.mulf %303, %304 : vector<4x512xf32>
    %306 = vector.broadcast %8 : vector<1x512xf32> to vector<4x512xf32>
    %307 = arith.addf %306, %305 : vector<4x512xf32>
    %308 = vector.extract_strided_slice %300 {offsets = [0, 0], sizes = [4, 1], strides = [1, 1]} : vector<4x128xf32> to vector<4x1xf32>
    %309 = vector.broadcast %308 : vector<4x1xf32> to vector<4x512xf32>
    %310 = vector.broadcast %3 : vector<1x512xf32> to vector<4x512xf32>
    %311 = arith.mulf %309, %310 : vector<4x512xf32>
    %312 = arith.addf %307, %311 : vector<4x512xf32>
    %313 = vector.extract_strided_slice %300 {offsets = [0, 1], sizes = [4, 1], strides = [1, 1]} : vector<4x128xf32> to vector<4x1xf32>
    %314 = vector.broadcast %313 : vector<4x1xf32> to vector<4x512xf32>
    %315 = vector.broadcast %4 : vector<1x512xf32> to vector<4x512xf32>
    %316 = arith.mulf %314, %315 : vector<4x512xf32>
    %317 = arith.addf %312, %316 : vector<4x512xf32>
    %318 = vector.extract_strided_slice %300 {offsets = [0, 2], sizes = [4, 1], strides = [1, 1]} : vector<4x128xf32> to vector<4x1xf32>
    %319 = vector.broadcast %318 : vector<4x1xf32> to vector<4x512xf32>
    %320 = vector.broadcast %5 : vector<1x512xf32> to vector<4x512xf32>
    %321 = arith.mulf %319, %320 : vector<4x512xf32>
    %322 = arith.addf %317, %321 : vector<4x512xf32>
    %323 = vector.extract_strided_slice %300 {offsets = [0, 3], sizes = [4, 1], strides = [1, 1]} : vector<4x128xf32> to vector<4x1xf32>
    %324 = vector.broadcast %323 : vector<4x1xf32> to vector<4x512xf32>
    %325 = vector.broadcast %6 : vector<1x512xf32> to vector<4x512xf32>
    %326 = arith.mulf %324, %325 : vector<4x512xf32>
    %327 = arith.addf %322, %326 : vector<4x512xf32>
    %328 = vector.extract_strided_slice %300 {offsets = [0, 4], sizes = [4, 1], strides = [1, 1]} : vector<4x128xf32> to vector<4x1xf32>
    %329 = vector.broadcast %328 : vector<4x1xf32> to vector<4x512xf32>
    %330 = vector.broadcast %7 : vector<1x512xf32> to vector<4x512xf32>
    %331 = arith.mulf %329, %330 : vector<4x512xf32>
    %332 = arith.addf %327, %331 : vector<4x512xf32>
    %333 = vector.extract_strided_slice %332 {offsets = [0, 0], sizes = [4, 384], strides = [1, 1]} : vector<4x512xf32> to vector<4x384xf32>
    %334 = arith.negf %333 : vector<4x384xf32>
    %335 = math.exp %334 : vector<4x384xf32>
    %cst_11 = arith.constant 1.000000e+00 : f32
    %336 = vector.broadcast %cst_11 : f32 to vector<4x384xf32>
    %337 = arith.addf %336, %335 : vector<4x384xf32>
    %338 = arith.divf %336, %337 : vector<4x384xf32>
    %339 = vector.extract_strided_slice %332 {offsets = [0, 384], sizes = [4, 128], strides = [1, 1]} : vector<4x512xf32> to vector<4x128xf32>
    %340 = math.tanh %339 : vector<4x128xf32>
    %341 = vector.extract_strided_slice %338 {offsets = [0, 0], sizes = [4, 128], strides = [1, 1]} : vector<4x384xf32> to vector<4x128xf32>
    %342 = vector.extract_strided_slice %338 {offsets = [0, 128], sizes = [4, 128], strides = [1, 1]} : vector<4x384xf32> to vector<4x128xf32>
    %343 = vector.extract_strided_slice %338 {offsets = [0, 256], sizes = [4, 128], strides = [1, 1]} : vector<4x384xf32> to vector<4x128xf32>
    %344 = arith.mulf %342, %298 : vector<4x128xf32>
    %345 = arith.mulf %341, %340 : vector<4x128xf32>
    %346 = arith.addf %344, %345 : vector<4x128xf32>
    %347 = math.tanh %346 : vector<4x128xf32>
    %348 = arith.mulf %343, %347 : vector<4x128xf32>
    %349 = vector.extract_strided_slice %0 {offsets = [7, 0, 0], sizes = [1, 4, 1], strides = [1, 1, 1]} : vector<10x4x1xf32> to vector<1x4x1xf32>
    %350 = vector.shape_cast %349 : vector<1x4x1xf32> to vector<4x1xf32>
    %351 = vector.broadcast %350 : vector<4x1xf32> to vector<4x512xf32>
    %352 = vector.broadcast %2 : vector<1x512xf32> to vector<4x512xf32>
    %353 = arith.mulf %351, %352 : vector<4x512xf32>
    %354 = vector.broadcast %8 : vector<1x512xf32> to vector<4x512xf32>
    %355 = arith.addf %354, %353 : vector<4x512xf32>
    %356 = vector.extract_strided_slice %348 {offsets = [0, 0], sizes = [4, 1], strides = [1, 1]} : vector<4x128xf32> to vector<4x1xf32>
    %357 = vector.broadcast %356 : vector<4x1xf32> to vector<4x512xf32>
    %358 = vector.broadcast %3 : vector<1x512xf32> to vector<4x512xf32>
    %359 = arith.mulf %357, %358 : vector<4x512xf32>
    %360 = arith.addf %355, %359 : vector<4x512xf32>
    %361 = vector.extract_strided_slice %348 {offsets = [0, 1], sizes = [4, 1], strides = [1, 1]} : vector<4x128xf32> to vector<4x1xf32>
    %362 = vector.broadcast %361 : vector<4x1xf32> to vector<4x512xf32>
    %363 = vector.broadcast %4 : vector<1x512xf32> to vector<4x512xf32>
    %364 = arith.mulf %362, %363 : vector<4x512xf32>
    %365 = arith.addf %360, %364 : vector<4x512xf32>
    %366 = vector.extract_strided_slice %348 {offsets = [0, 2], sizes = [4, 1], strides = [1, 1]} : vector<4x128xf32> to vector<4x1xf32>
    %367 = vector.broadcast %366 : vector<4x1xf32> to vector<4x512xf32>
    %368 = vector.broadcast %5 : vector<1x512xf32> to vector<4x512xf32>
    %369 = arith.mulf %367, %368 : vector<4x512xf32>
    %370 = arith.addf %365, %369 : vector<4x512xf32>
    %371 = vector.extract_strided_slice %348 {offsets = [0, 3], sizes = [4, 1], strides = [1, 1]} : vector<4x128xf32> to vector<4x1xf32>
    %372 = vector.broadcast %371 : vector<4x1xf32> to vector<4x512xf32>
    %373 = vector.broadcast %6 : vector<1x512xf32> to vector<4x512xf32>
    %374 = arith.mulf %372, %373 : vector<4x512xf32>
    %375 = arith.addf %370, %374 : vector<4x512xf32>
    %376 = vector.extract_strided_slice %348 {offsets = [0, 4], sizes = [4, 1], strides = [1, 1]} : vector<4x128xf32> to vector<4x1xf32>
    %377 = vector.broadcast %376 : vector<4x1xf32> to vector<4x512xf32>
    %378 = vector.broadcast %7 : vector<1x512xf32> to vector<4x512xf32>
    %379 = arith.mulf %377, %378 : vector<4x512xf32>
    %380 = arith.addf %375, %379 : vector<4x512xf32>
    %381 = vector.extract_strided_slice %380 {offsets = [0, 0], sizes = [4, 384], strides = [1, 1]} : vector<4x512xf32> to vector<4x384xf32>
    %382 = arith.negf %381 : vector<4x384xf32>
    %383 = math.exp %382 : vector<4x384xf32>
    %cst_12 = arith.constant 1.000000e+00 : f32
    %384 = vector.broadcast %cst_12 : f32 to vector<4x384xf32>
    %385 = arith.addf %384, %383 : vector<4x384xf32>
    %386 = arith.divf %384, %385 : vector<4x384xf32>
    %387 = vector.extract_strided_slice %380 {offsets = [0, 384], sizes = [4, 128], strides = [1, 1]} : vector<4x512xf32> to vector<4x128xf32>
    %388 = math.tanh %387 : vector<4x128xf32>
    %389 = vector.extract_strided_slice %386 {offsets = [0, 0], sizes = [4, 128], strides = [1, 1]} : vector<4x384xf32> to vector<4x128xf32>
    %390 = vector.extract_strided_slice %386 {offsets = [0, 128], sizes = [4, 128], strides = [1, 1]} : vector<4x384xf32> to vector<4x128xf32>
    %391 = vector.extract_strided_slice %386 {offsets = [0, 256], sizes = [4, 128], strides = [1, 1]} : vector<4x384xf32> to vector<4x128xf32>
    %392 = arith.mulf %390, %346 : vector<4x128xf32>
    %393 = arith.mulf %389, %388 : vector<4x128xf32>
    %394 = arith.addf %392, %393 : vector<4x128xf32>
    %395 = math.tanh %394 : vector<4x128xf32>
    %396 = arith.mulf %391, %395 : vector<4x128xf32>
    %397 = vector.extract_strided_slice %0 {offsets = [8, 0, 0], sizes = [1, 4, 1], strides = [1, 1, 1]} : vector<10x4x1xf32> to vector<1x4x1xf32>
    %398 = vector.shape_cast %397 : vector<1x4x1xf32> to vector<4x1xf32>
    %399 = vector.broadcast %398 : vector<4x1xf32> to vector<4x512xf32>
    %400 = vector.broadcast %2 : vector<1x512xf32> to vector<4x512xf32>
    %401 = arith.mulf %399, %400 : vector<4x512xf32>
    %402 = vector.broadcast %8 : vector<1x512xf32> to vector<4x512xf32>
    %403 = arith.addf %402, %401 : vector<4x512xf32>
    %404 = vector.extract_strided_slice %396 {offsets = [0, 0], sizes = [4, 1], strides = [1, 1]} : vector<4x128xf32> to vector<4x1xf32>
    %405 = vector.broadcast %404 : vector<4x1xf32> to vector<4x512xf32>
    %406 = vector.broadcast %3 : vector<1x512xf32> to vector<4x512xf32>
    %407 = arith.mulf %405, %406 : vector<4x512xf32>
    %408 = arith.addf %403, %407 : vector<4x512xf32>
    %409 = vector.extract_strided_slice %396 {offsets = [0, 1], sizes = [4, 1], strides = [1, 1]} : vector<4x128xf32> to vector<4x1xf32>
    %410 = vector.broadcast %409 : vector<4x1xf32> to vector<4x512xf32>
    %411 = vector.broadcast %4 : vector<1x512xf32> to vector<4x512xf32>
    %412 = arith.mulf %410, %411 : vector<4x512xf32>
    %413 = arith.addf %408, %412 : vector<4x512xf32>
    %414 = vector.extract_strided_slice %396 {offsets = [0, 2], sizes = [4, 1], strides = [1, 1]} : vector<4x128xf32> to vector<4x1xf32>
    %415 = vector.broadcast %414 : vector<4x1xf32> to vector<4x512xf32>
    %416 = vector.broadcast %5 : vector<1x512xf32> to vector<4x512xf32>
    %417 = arith.mulf %415, %416 : vector<4x512xf32>
    %418 = arith.addf %413, %417 : vector<4x512xf32>
    %419 = vector.extract_strided_slice %396 {offsets = [0, 3], sizes = [4, 1], strides = [1, 1]} : vector<4x128xf32> to vector<4x1xf32>
    %420 = vector.broadcast %419 : vector<4x1xf32> to vector<4x512xf32>
    %421 = vector.broadcast %6 : vector<1x512xf32> to vector<4x512xf32>
    %422 = arith.mulf %420, %421 : vector<4x512xf32>
    %423 = arith.addf %418, %422 : vector<4x512xf32>
    %424 = vector.extract_strided_slice %396 {offsets = [0, 4], sizes = [4, 1], strides = [1, 1]} : vector<4x128xf32> to vector<4x1xf32>
    %425 = vector.broadcast %424 : vector<4x1xf32> to vector<4x512xf32>
    %426 = vector.broadcast %7 : vector<1x512xf32> to vector<4x512xf32>
    %427 = arith.mulf %425, %426 : vector<4x512xf32>
    %428 = arith.addf %423, %427 : vector<4x512xf32>
    %429 = vector.extract_strided_slice %428 {offsets = [0, 0], sizes = [4, 384], strides = [1, 1]} : vector<4x512xf32> to vector<4x384xf32>
    %430 = arith.negf %429 : vector<4x384xf32>
    %431 = math.exp %430 : vector<4x384xf32>
    %cst_13 = arith.constant 1.000000e+00 : f32
    %432 = vector.broadcast %cst_13 : f32 to vector<4x384xf32>
    %433 = arith.addf %432, %431 : vector<4x384xf32>
    %434 = arith.divf %432, %433 : vector<4x384xf32>
    %435 = vector.extract_strided_slice %428 {offsets = [0, 384], sizes = [4, 128], strides = [1, 1]} : vector<4x512xf32> to vector<4x128xf32>
    %436 = math.tanh %435 : vector<4x128xf32>
    %437 = vector.extract_strided_slice %434 {offsets = [0, 0], sizes = [4, 128], strides = [1, 1]} : vector<4x384xf32> to vector<4x128xf32>
    %438 = vector.extract_strided_slice %434 {offsets = [0, 128], sizes = [4, 128], strides = [1, 1]} : vector<4x384xf32> to vector<4x128xf32>
    %439 = vector.extract_strided_slice %434 {offsets = [0, 256], sizes = [4, 128], strides = [1, 1]} : vector<4x384xf32> to vector<4x128xf32>
    %440 = arith.mulf %438, %394 : vector<4x128xf32>
    %441 = arith.mulf %437, %436 : vector<4x128xf32>
    %442 = arith.addf %440, %441 : vector<4x128xf32>
    %443 = math.tanh %442 : vector<4x128xf32>
    %444 = arith.mulf %439, %443 : vector<4x128xf32>
    %445 = vector.extract_strided_slice %0 {offsets = [9, 0, 0], sizes = [1, 4, 1], strides = [1, 1, 1]} : vector<10x4x1xf32> to vector<1x4x1xf32>
    %446 = vector.shape_cast %445 : vector<1x4x1xf32> to vector<4x1xf32>
    %447 = vector.broadcast %446 : vector<4x1xf32> to vector<4x512xf32>
    %448 = vector.broadcast %2 : vector<1x512xf32> to vector<4x512xf32>
    %449 = arith.mulf %447, %448 : vector<4x512xf32>
    %450 = vector.broadcast %8 : vector<1x512xf32> to vector<4x512xf32>
    %451 = arith.addf %450, %449 : vector<4x512xf32>
    %452 = vector.extract_strided_slice %444 {offsets = [0, 0], sizes = [4, 1], strides = [1, 1]} : vector<4x128xf32> to vector<4x1xf32>
    %453 = vector.broadcast %452 : vector<4x1xf32> to vector<4x512xf32>
    %454 = vector.broadcast %3 : vector<1x512xf32> to vector<4x512xf32>
    %455 = arith.mulf %453, %454 : vector<4x512xf32>
    %456 = arith.addf %451, %455 : vector<4x512xf32>
    %457 = vector.extract_strided_slice %444 {offsets = [0, 1], sizes = [4, 1], strides = [1, 1]} : vector<4x128xf32> to vector<4x1xf32>
    %458 = vector.broadcast %457 : vector<4x1xf32> to vector<4x512xf32>
    %459 = vector.broadcast %4 : vector<1x512xf32> to vector<4x512xf32>
    %460 = arith.mulf %458, %459 : vector<4x512xf32>
    %461 = arith.addf %456, %460 : vector<4x512xf32>
    %462 = vector.extract_strided_slice %444 {offsets = [0, 2], sizes = [4, 1], strides = [1, 1]} : vector<4x128xf32> to vector<4x1xf32>
    %463 = vector.broadcast %462 : vector<4x1xf32> to vector<4x512xf32>
    %464 = vector.broadcast %5 : vector<1x512xf32> to vector<4x512xf32>
    %465 = arith.mulf %463, %464 : vector<4x512xf32>
    %466 = arith.addf %461, %465 : vector<4x512xf32>
    %467 = vector.extract_strided_slice %444 {offsets = [0, 3], sizes = [4, 1], strides = [1, 1]} : vector<4x128xf32> to vector<4x1xf32>
    %468 = vector.broadcast %467 : vector<4x1xf32> to vector<4x512xf32>
    %469 = vector.broadcast %6 : vector<1x512xf32> to vector<4x512xf32>
    %470 = arith.mulf %468, %469 : vector<4x512xf32>
    %471 = arith.addf %466, %470 : vector<4x512xf32>
    %472 = vector.extract_strided_slice %444 {offsets = [0, 4], sizes = [4, 1], strides = [1, 1]} : vector<4x128xf32> to vector<4x1xf32>
    %473 = vector.broadcast %472 : vector<4x1xf32> to vector<4x512xf32>
    %474 = vector.broadcast %7 : vector<1x512xf32> to vector<4x512xf32>
    %475 = arith.mulf %473, %474 : vector<4x512xf32>
    %476 = arith.addf %471, %475 : vector<4x512xf32>
    %477 = vector.extract_strided_slice %476 {offsets = [0, 0], sizes = [4, 384], strides = [1, 1]} : vector<4x512xf32> to vector<4x384xf32>
    %478 = arith.negf %477 : vector<4x384xf32>
    %479 = math.exp %478 : vector<4x384xf32>
    %cst_14 = arith.constant 1.000000e+00 : f32
    %480 = vector.broadcast %cst_14 : f32 to vector<4x384xf32>
    %481 = arith.addf %480, %479 : vector<4x384xf32>
    %482 = arith.divf %480, %481 : vector<4x384xf32>
    %483 = vector.extract_strided_slice %476 {offsets = [0, 384], sizes = [4, 128], strides = [1, 1]} : vector<4x512xf32> to vector<4x128xf32>
    %484 = math.tanh %483 : vector<4x128xf32>
    %485 = vector.extract_strided_slice %482 {offsets = [0, 0], sizes = [4, 128], strides = [1, 1]} : vector<4x384xf32> to vector<4x128xf32>
    %486 = vector.extract_strided_slice %482 {offsets = [0, 128], sizes = [4, 128], strides = [1, 1]} : vector<4x384xf32> to vector<4x128xf32>
    %487 = vector.extract_strided_slice %482 {offsets = [0, 256], sizes = [4, 128], strides = [1, 1]} : vector<4x384xf32> to vector<4x128xf32>
    %488 = arith.mulf %486, %442 : vector<4x128xf32>
    %489 = arith.mulf %485, %484 : vector<4x128xf32>
    %490 = arith.addf %488, %489 : vector<4x128xf32>
    %491 = math.tanh %490 : vector<4x128xf32>
    %492 = arith.mulf %487, %491 : vector<4x128xf32>
    %493 = tpu.iota {dimensions = array<i32: 1>} : vector<4x128xi32>
    %cst_15 = arith.constant 0.000000e+00 : f32
    %494 = vector.broadcast %cst_15 : f32 to vector<4x128xf32>
    %495 = vector.broadcast %9 : vector<1x128xf32> to vector<4x128xf32>
    %496 = arith.mulf %492, %495 : vector<4x128xf32>
    %cst_16 = arith.constant dense<0.000000e+00> : vector<4xf32>
    %497 = vector.multi_reduction <add>, %496, %cst_16 [1] : vector<4x128xf32> to vector<4xf32>
    %498 = vector.shape_cast %497 : vector<4xf32> to vector<4x1xf32>
    %c0_i32 = arith.constant 0 : i32
    %499 = vector.broadcast %c0_i32 : i32 to vector<4x128xi32>
    %500 = arith.cmpi eq, %493, %499 : vector<4x128xi32>
    %501 = vector.shape_cast %498 : vector<4x1xf32> to vector<4x1xf32>
    %502 = vector.broadcast %501 : vector<4x1xf32> to vector<4x128xf32>
    %503 = arith.select %500, %502, %494 : vector<4x128xi1>, vector<4x128xf32>
    %504 = vector.broadcast %10 : vector<1x128xf32> to vector<4x128xf32>
    %505 = arith.addf %503, %504 : vector<4x128xf32>
    %c0_17 = arith.constant 0 : index
    %c0_18 = arith.constant 0 : index
    %506 = vector.load %arg2[%c0_17, %c0_18] : memref<4x128xf32, #tpu.memory_space<vmem>>, vector<4x128xf32>
    tpu.vector_store %arg2[%c0_17, %c0_18], %505 {strides = array<i32>} : memref<4x128xf32, #tpu.memory_space<vmem>>, vector<4x128xf32>,
    return
  }
}

</mosaic_0001>

<bundles_post_ra>
// kernel: tpu_custom_call.1
= control target key start
LH: loop header
LB: loop body
LE: loop exit
PB: predicated region body
PF: predicated region fallthrough
CT: control target
= control target key end

     0   :  { %7 = vsyncpa [#allocation3], 0  ;;  %s2250_s0 = inlined_call_operand.vmem [shape: f32[10,4,1], index: 0, kind: input, shape index: {}]   ;;  %s2251_s1 = inlined_call_operand.hbm [shape: f32[9,512], index: 1, kind: input, shape index: {}]   ;;  %s2252_s2 = inlined_call_operand.hbm [shape: f32[4,128], index: 2, kind: output, shape index: {}]  }
   0x1   :  { %8 = vsyncpa [#allocation4], 0  ;;  %s15_s11 = sshll.u32 %s2251_s1, 4  ;;  %s1756_s12 = smov [#allocation2]   ;;  %s16_s11 = int_to_ptr.hbm [resolvable:$true] %s15_s11 }
   0x2   :  { %s17_s13 = sshll.u32 %s1756_s12, 4  ;;  %s1757_s14 = smov 512   ;;  %s18_s13 = int_to_ptr.vmem [resolvable:$true] %s17_s13 }
   0x3   :  { %s1758_s15 = smov 32  }
   0x4   :  { %23 = dma.hbm_to_vmem [thread:$0]  %s16_s11, 1024, %s18_s13, [#allocation3], %s1757_s14, %s1757_s14, %s1758_s15  }
   0x5   :  { %1752 = dma.done.wait [#allocation3], 1024  }
   0x6   :  { %1753 = vsyncadd [#allocation3], 4294966272  ;;  %v1759_v0 = vmov 0   ;;  %v28_v1 = vld [vmem:[%s2250_s0] sm:$0xf]  ;;  %v39_v4 = vld [vmem:[#allocation2 + $0x8] sm:$0xff] }
   0x7   :  { %1489 = vset.pattern.permute.xlu0 %v1759_v0  ;;  %1490 = vset.pattern.permute.xlu1 %v1759_v0  ;;  %v29_v2 = vld [vmem:[%s2250_s0 + $0x4] sm:$0xf]  ;;  %v40_v5 = vld [vmem:[#allocation2 + $0x10] sm:$0xff]  ;;  %v1791_v6 = vld [vmem:[#allocation2 + $0x18] sm:$0xff]  ;;  %v1795_v8 = vperm.slane %v39_v4, 1  ;;  %v1801_v11 = vperm.slane %v39_v4, 2 }
   0x8   :  { %45 = vperm.xlu0 %1489, %v28_v1   ;;  %v38_v3 = vld [vmem:[#allocation2] sm:$0xff]  ;;  %v1797_v9 = vperm.slane %v40_v5, 1  ;;  %v1803_v12 = vperm.slane %v40_v5, 2  ;;  %v1807_v14 = vperm.slane %v39_v4, 0  ;;  %v1809_v15 = vperm.slane %v40_v5, 0  ;;  %s1440_s10 = sshll.u32 %s2252_s2, 4  ;;  %s1441_s10 = int_to_ptr.hbm [resolvable:$true] %s1440_s10 }
   0x9   :  { %v1793_v7 = vperm.slane %v38_v3, 1  ;;  %v1799_v10 = vperm.slane %v38_v3, 2  ;;  %v1805_v13 = vperm.slane %v38_v3, 0  ;;  %v1811_v16 = vperm.slane %v38_v3, 3 }
   0xa   :  { %v1814_v17 = vperm.slane %v1791_v6, 0  ;;  %v1816_v18 = vperm.slane %v38_v3, 6  ;;  %v1818_v19 = vperm.slane %v39_v4, 3  ;;  %v1820_v20 = vperm.slane %v40_v5, 3 }
   0xb   :  { %v1822_v21 = vperm.slane %v39_v4, 6  ;;  %v1824_v22 = vperm.slane %v40_v5, 6  ;;  %v68_v23 = vmul.f32 0.0, %v1793_v7  ;;  %v69_v24 = vmul.f32 0.0, %v1795_v8 }
   0xc   :  { %v70_v25 = vmul.f32 0.0, %v1797_v9  ;;  %v80_v26 = vmul.f32 0.0, %v1799_v10  ;;  %v81_v27 = vmul.f32 0.0, %v1801_v11  ;;  %v82_v28 = vmul.f32 0.0, %v1803_v12 }
   0xd   :  { %v92_v30 = vmul.f32 0.0, %v1811_v16  ;;  %v93_v34 = vmul.f32 0.0, %v1818_v19  ;;  %v94_v35 = vmul.f32 0.0, %v1820_v20  ;;  %v1838_v36 = vperm.slane %v38_v3, 4 }
   0xe   :  { %v1840_v37 = vperm.slane %v39_v4, 4  ;;  %v1842_v38 = vperm.slane %v40_v5, 4  ;;  %v1847_v42 = vperm.slane %v38_v3, 5  ;;  %v1849_v43 = vperm.slane %v39_v4, 5 }
   0xf   :  { %v1851_v44 = vperm.slane %v40_v5, 5  ;;  %v1760_v48 = vmov 2   ;;  %v1855_v49 = vperm.slane %v1791_v6, 6  ;;  %v104_v50 = vmul.f32 0.0, %v1838_v36 }
  0x10   :  { %189 = vperm.xlu0 %1489, %v29_v2   ;;  %1492 = vset.pattern.permute.xlu2 %v1760_v48  ;;  %v105_v51 = vmul.f32 0.0, %v1840_v37  ;;  %v1761_v52 = vmov 4   ;;  %v106_v53 = vmul.f32 0.0, %v1842_v38  ;;  %v1862_v57 = vperm.slane %v1791_v6, 1 }
  0x11   :  { %v116_v58 = vmul.f32 0.0, %v1847_v42  ;;  %v117_v59 = vmul.f32 0.0, %v1849_v43  ;;  %v118_v61 = vmul.f32 0.0, %v1851_v44 }
  0x12   :  { %v71_v5 = vmul.f32 0.0, %v1862_v57 }
  0x18   :  { %1494 = vset.pattern.permute.xlu0 %v1761_v52 }
  0x7a   :  { %v46_v29 = vpop.permute.xlu0 %45 }
  0x7b   :  { %v52_v31 = vmul.f32 %v1805_v13, %v46_v29  ;;  %v53_v32 = vmul.f32 %v1807_v14, %v46_v29  ;;  %v54_v33 = vmul.f32 %v1809_v15, %v46_v29  ;;  %v55_v60 = vmul.f32 %v1814_v17, %v46_v29 }
  0x7d   :  { %v60_v39 = vadd.f32 %v1816_v18, %v52_v31  ;;  %v61_v40 = vadd.f32 %v1822_v21, %v53_v32  ;;  %v62_v41 = vadd.f32 %v1824_v22, %v54_v33  ;;  %v1875_v32 = vperm.slane %v1791_v6, 3 }
  0x7f   :  { %v72_v45 = vadd.f32 %v68_v23, %v60_v39  ;;  %v73_v46 = vadd.f32 %v69_v24, %v61_v40  ;;  %v74_v47 = vadd.f32 %v70_v25, %v62_v41  ;;  %v1870_v23 = vperm.slane %v1791_v6, 2 }
  0x80   :  { %v63_v24 = vadd.f32 %v1855_v49, %v55_v60 }
  0x81   :  { %v84_v54 = vadd.f32 %v80_v26, %v72_v45  ;;  %v85_v55 = vadd.f32 %v81_v27, %v73_v46  ;;  %v86_v56 = vadd.f32 %v82_v28, %v74_v47  ;;  %v1883_v46 = vperm.slane %v1791_v6, 5 }
  0x82   :  { %v75_v33 = vadd.f32 %v71_v5, %v63_v24 }
  0x83   :  { %v96_v62 = vadd.f32 %v92_v30, %v84_v54  ;;  %v97_v63 = vadd.f32 %v93_v34, %v85_v55  ;;  %v98_v1 = vadd.f32 %v94_v35, %v86_v56  ;;  %v83_v30 = vmul.f32 0.0, %v1870_v23 }
  0x84   :  { %v95_v34 = vmul.f32 0.0, %v1875_v32  ;;  %v1879_v35 = vperm.slane %v1791_v6, 4  ;;  %v119_v55 = vmul.f32 0.0, %v1883_v46 }
  0x85   :  { %v108_v2 = vadd.f32 %v104_v50, %v96_v62  ;;  %v109_v3 = vadd.f32 %v105_v51, %v97_v63  ;;  %v110_v4 = vadd.f32 %v106_v53, %v98_v1  ;;  %v87_v39 = vadd.f32 %v83_v30, %v75_v33 }
  0x86   :  { %v107_v45 = vmul.f32 0.0, %v1879_v35 }
  0x87   :  { %v120_v25 = vadd.f32 %v116_v58, %v108_v2  ;;  %v121_v26 = vadd.f32 %v117_v59, %v109_v3  ;;  %v122_v27 = vadd.f32 %v118_v61, %v110_v4  ;;  %v99_v47 = vadd.f32 %v95_v34, %v87_v39 }
  0x89   :  { %v1450_v28 = vmul.f32 -1.442695, %v120_v25  ;;  %v1451_v29 = vmul.f32 -1.442695, %v121_v26  ;;  %v1452_v31 = vmul.f32 -1.442695, %v122_v27  ;;  %v111_v56 = vadd.f32 %v107_v45, %v99_v47 }
  0x8b   :  { %1543 = vpow2.f32 %v1450_v28  ;;  %v123_v59 = vadd.f32 %v119_v55, %v111_v56 }
  0x8c   :  { %1545 = vpow2.f32 %v1451_v29 }
  0x8d   :  { %1547 = vpow2.f32 %v1452_v31 }
  0x91   :  { %v1544_v40 = vpop.eup %1543 }
  0x92   :  { %v1546_v41 = vpop.eup %1545  ;;  %v133_v50 = vadd.f32 1.0, %v1544_v40 }
  0x93   :  { %v1548_v51 = vpop.eup %1547  ;;  %v134_v53 = vadd.f32 1.0, %v1546_v41 }
  0x94   :  { %v135_v54 = vadd.f32 1.0, %v1548_v51  ;;  %1549 = vrcp.f32 %v133_v50  ;;  %v147_v3 = vand.u32 2147483648, %v133_v50  ;;  %v145_v5 = vand.u32 2147483647, %v133_v50 }
  0x95   :  { %1551 = vrcp.f32 %v134_v53  ;;  %v162_v24 = vand.u32 2147483648, %v134_v53  ;;  %v160_v26 = vand.u32 2147483647, %v134_v53  ;;  %vm141_vm2 = vweird.f32 %v133_v50 }
  0x96   :  { %1553 = vrcp.f32 %v135_v54  ;;  %v148_v29 = vor.u32 1.1754944e-38, %v147_v3  ;;  %vm156_vm4 = vweird.f32 %v134_v53  ;;  %vm146_vm5 = vcmp.eq.f32.partialorder %v145_v5, 8.507059e+37 }
  0x97   :  { %1555 = vtanh.f32 %v123_v59  ;;  %v163_v33 = vor.u32 1.1754944e-38, %v162_v24  ;;  %vm161_vm7 = vcmp.eq.f32.partialorder %v160_v26, 8.507059e+37  ;;  %v177_v56 = vand.u32 2147483648, %v135_v54  ;;  %v30_v24 = vld [vmem:[%s2250_s0 + $0x8] sm:$0xf] }
  0x98   :  { %vm171_vm9 = vweird.f32 %v135_v54 }
  0x99   :  { %v178_v59 = vor.u32 1.1754944e-38, %v177_v56 }
  0x9a   :  { %v1550_v58 = vpop.eup %1549 }
  0x9b   :  { %v1552_v60 = vpop.eup %1551  ;;  %v137_v61 = vmul.f32 %v1550_v58, %v133_v50  ;;  %vm142_vm0 = vweird.f32 %v1550_v58 }
  0x9c   :  { %v1554_v62 = vpop.eup %1553  ;;  %v152_v63 = vmul.f32 %v1552_v60, %v134_v53  ;;  %vm157_vm1 = vweird.f32 %v1552_v60  ;;  %vm143_vm3 = vmor %vm141_vm2, %vm142_vm0  ;;  %v175_v53 = vand.u32 2147483647, %v135_v54 }
  0x9d   :  { %v138_v1 = vsub.f32 1.0, %v137_v61  ;;  %v167_v6 = vmul.f32 %v1554_v62, %v135_v54  ;;  %vm158_vm6 = vmor %vm156_vm4, %vm157_vm1  ;;  %v1556_v34 = vpop.eup %1555  ;;  %vm172_vm8 = vweird.f32 %v1554_v62  ;;  %v190_v54 = vpop.permute.xlu0 %189 }
  0x9e   :  { %v153_v2 = vsub.f32 1.0, %v152_v63  ;;  %vm173_vm10 = vmor %vm171_vm9, %vm172_vm8  ;;  %vm176_vm11 = vcmp.eq.f32.partialorder %v175_v53, 8.507059e+37  ;;  %v192_v3 = vmul.f32 %v190_v54, %v1805_v13  ;;  %v194_v5 = vmul.f32 %v190_v54, %v1809_v15 }
  0x9f   :  { %v139_v4 = vmul.f32 %v1550_v58, %v138_v1  ;;  %v168_v28 = vsub.f32 1.0, %v167_v6  ;;  %v1762_v1 = vmov 3   ;;  %v1763_v6 = vmov 1  }
  0xa0   :  { %v154_v25 = vmul.f32 %v1552_v60, %v153_v2 }
  0xa1   :  { %v140_v27 = vadd.f32 %v1550_v58, %v139_v4  ;;  %v169_v45 = vmul.f32 %v1554_v62, %v168_v28  ;;  %v193_v4 = vmul.f32 %v190_v54, %v1807_v14  ;;  %v196_v28 = vadd.f32 %v192_v3, %v1816_v18 }
  0xa2   :  { %v155_v31 = vadd.f32 %v1552_v60, %v154_v25 }
  0xa3   :  { %v144_v30 = vsel %vm143_vm3, %v1550_v58, %v140_v27  ;;  %v170_v50 = vadd.f32 %v1554_v62, %v169_v45 }
  0xa4   :  { %v149_v39 = vsel %vm146_vm5, %v148_v29, %v144_v30  ;;  %v159_v40 = vsel %vm158_vm6, %v1552_v60, %v155_v31  ;;  %v197_v29 = vadd.f32 %v193_v4, %v1822_v21  ;;  %v198_v31 = vadd.f32 %v194_v5, %v1824_v22 }
  0xa5   :  { %v164_v41 = vsel %vm161_vm7, %v163_v33, %v159_v40  ;;  %v183_v47 = vmul.f32 %v1556_v34, %v149_v39  ;;  %v174_v58 = vsel %vm173_vm10, %v1554_v62, %v170_v50 }
  0xa6   :  { %v182_v51 = vmul.f32 0.0, %v164_v41  ;;  %v179_v60 = vsel %vm176_vm11, %v178_v59, %v174_v58 }
  0xa8   :  { %v1886_v55 = vadd.f32 %v183_v47, %v182_v51 }
  0xaa   :  { %1557 = vtanh.f32 %v1886_v55 }
  0xb0   :  { %v1558_v61 = vpop.eup %1557 }
  0xb1   :  { %v186_v63 = vmul.f32 %v1558_v61, %v179_v60 }
  0xb3   :  { %250 = vperm.xlu0 %1494, %v186_v63   ;;  %226 = vperm.xlu2 %1492, %v186_v63  }
  0xb4   :  { %202 = vperm.xlu1 %1490, %v186_v63  }
  0xbb   :  { %1493 = vset.pattern.permute.xlu2 %v1762_v1  ;;  %1499 = vset.pattern.permute.xlu0 %v1762_v1 }
  0xbc   :  { %1491 = vset.pattern.permute.xlu1 %v1763_v6  ;;  %238 = vperm.xlu2 %1493, %v186_v63  }
  0xbd   :  { %214 = vperm.xlu1 %1491, %v186_v63  }
  0xc4   :  { %1496 = vset.pattern.permute.xlu2 %v1759_v0 }
  0xc5   :  { %1495 = vset.pattern.permute.xlu1 %v1759_v0 }
  0xc6   :  { %326 = vperm.xlu1 %1495, %v30_v24  }
  0xce   :  { %1497 = vset.pattern.permute.xlu1 %v1763_v6 }
 0x10d   :  { %v227_v62 = vpop.permute.xlu2 %226 }
 0x10e   :  { %v229_v51 = vmul.f32 %v227_v62, %v1811_v16  ;;  %v230_v50 = vmul.f32 %v227_v62, %v1818_v19  ;;  %v231_v56 = vmul.f32 %v227_v62, %v1820_v20 }
 0x116   :  { %v239_v39 = vpop.permute.xlu2 %238 }
 0x117   :  { %v241_v60 = vmul.f32 %v239_v39, %v1838_v36  ;;  %v242_v63 = vmul.f32 %v239_v39, %v1840_v37  ;;  %v243_v3 = vmul.f32 %v239_v39, %v1842_v38 }
 0x125   :  { %v251_v53 = vpop.permute.xlu0 %250 }
 0x126   :  { %v203_v2 = vpop.permute.xlu1 %202 }
 0x127   :  { %v205_v25 = vmul.f32 %v203_v2, %v1793_v7  ;;  %v206_v26 = vmul.f32 %v203_v2, %v1795_v8  ;;  %v207_v27 = vmul.f32 %v203_v2, %v1797_v9 }
 0x129   :  { %v209_v30 = vadd.f32 %v205_v25, %v196_v28  ;;  %v210_v33 = vadd.f32 %v206_v26, %v197_v29  ;;  %v211_v40 = vadd.f32 %v207_v27, %v198_v31  ;;  %v253_v25 = vmul.f32 %v251_v53, %v1847_v42 }
 0x12a   :  { %v254_v26 = vmul.f32 %v251_v53, %v1849_v43  ;;  %v255_v27 = vmul.f32 %v251_v53, %v1851_v44 }
 0x12f   :  { %v215_v34 = vpop.permute.xlu1 %214 }
 0x130   :  { %v217_v41 = vmul.f32 %v215_v34, %v1799_v10  ;;  %v218_v45 = vmul.f32 %v215_v34, %v1801_v11  ;;  %v219_v47 = vmul.f32 %v215_v34, %v1803_v12 }
 0x132   :  { %v221_v58 = vadd.f32 %v217_v41, %v209_v30  ;;  %v222_v59 = vadd.f32 %v218_v45, %v210_v33  ;;  %v223_v61 = vadd.f32 %v219_v47, %v211_v40  ;;  %v195_v30 = vmul.f32 %v190_v54, %v1814_v17 }
 0x133   :  { %v208_v45 = vmul.f32 %v203_v2, %v1862_v57 }
 0x134   :  { %v233_v4 = vadd.f32 %v229_v51, %v221_v58  ;;  %v234_v5 = vadd.f32 %v230_v50, %v222_v59  ;;  %v235_v24 = vadd.f32 %v231_v56, %v223_v61  ;;  %v199_v56 = vadd.f32 %v195_v30, %v1855_v49 }
 0x135   :  { %v220_v58 = vmul.f32 %v215_v34, %v1870_v23  ;;  %v256_v34 = vmul.f32 %v251_v53, %v1883_v46 }
 0x136   :  { %v245_v28 = vadd.f32 %v241_v60, %v233_v4  ;;  %v246_v29 = vadd.f32 %v242_v63, %v234_v5  ;;  %v247_v31 = vadd.f32 %v243_v3, %v235_v24  ;;  %v212_v59 = vadd.f32 %v208_v45, %v199_v56 }
 0x137   :  { %v232_v60 = vmul.f32 %v227_v62, %v1875_v32  ;;  %v244_v24 = vmul.f32 %v239_v39, %v1879_v35 }
 0x138   :  { %v257_v33 = vadd.f32 %v253_v25, %v245_v28  ;;  %v258_v40 = vadd.f32 %v254_v26, %v246_v29  ;;  %v259_v41 = vadd.f32 %v255_v27, %v247_v31  ;;  %v224_v61 = vadd.f32 %v220_v58, %v212_v59 }
 0x13a   :  { %v1453_v47 = vmul.f32 -1.442695, %v257_v33  ;;  %v1454_v51 = vmul.f32 -1.442695, %v258_v40  ;;  %v1455_v50 = vmul.f32 -1.442695, %v259_v41  ;;  %v236_v3 = vadd.f32 %v232_v60, %v224_v61 }
 0x13c   :  { %1559 = vpow2.f32 %v1453_v47  ;;  %v248_v26 = vadd.f32 %v244_v24, %v236_v3 }
 0x13d   :  { %1561 = vpow2.f32 %v1454_v51 }
 0x13e   :  { %1563 = vpow2.f32 %v1455_v50  ;;  %v260_v28 = vadd.f32 %v256_v34, %v248_v26 }
 0x142   :  { %v1560_v54 = vpop.eup %1559 }
 0x143   :  { %v1562_v63 = vpop.eup %1561  ;;  %v270_v4 = vadd.f32 1.0, %v1560_v54 }
 0x144   :  { %v1564_v5 = vpop.eup %1563  ;;  %v271_v2 = vadd.f32 1.0, %v1562_v63 }
 0x145   :  { %v272_v25 = vadd.f32 1.0, %v1564_v5  ;;  %1565 = vrcp.f32 %v270_v4  ;;  %v284_v41 = vand.u32 2147483648, %v270_v4  ;;  %v282_v39 = vand.u32 2147483647, %v270_v4 }
 0x146   :  { %1567 = vrcp.f32 %v271_v2  ;;  %v299_v51 = vand.u32 2147483648, %v271_v2  ;;  %v297_v56 = vand.u32 2147483647, %v271_v2  ;;  %vm278_vm14 = vweird.f32 %v270_v4 }
 0x147   :  { %1569 = vrcp.f32 %v272_v25  ;;  %v285_v59 = vor.u32 1.1754944e-38, %v284_v41  ;;  %vm293_vm0 = vweird.f32 %v271_v2  ;;  %vm283_vm1 = vcmp.eq.f32.partialorder %v282_v39, 8.507059e+37 }
 0x148   :  { %1571 = vtanh.f32 %v260_v28  ;;  %v300_v54 = vor.u32 1.1754944e-38, %v299_v51  ;;  %vm298_vm3 = vcmp.eq.f32.partialorder %v297_v56, 8.507059e+37  ;;  %vm308_vm5 = vweird.f32 %v272_v25 }
 0x14b   :  { %v1566_v27 = vpop.eup %1565 }
 0x14c   :  { %v1568_v29 = vpop.eup %1567  ;;  %v274_v31 = vmul.f32 %v1566_v27, %v270_v4  ;;  %vm279_vm12 = vweird.f32 %v1566_v27 }
 0x14d   :  { %v1570_v62 = vpop.eup %1569  ;;  %v289_v30 = vmul.f32 %v1568_v29, %v271_v2  ;;  %vm294_vm13 = vweird.f32 %v1568_v29  ;;  %vm280_vm15 = vmor %vm278_vm14, %vm279_vm12  ;;  %v312_v2 = vand.u32 2147483647, %v272_v25 }
 0x14e   :  { %v275_v33 = vsub.f32 1.0, %v274_v31  ;;  %v304_v40 = vmul.f32 %v1570_v62, %v272_v25  ;;  %vm295_vm2 = vmor %vm293_vm0, %vm294_vm13  ;;  %v1572_v63 = vpop.eup %1571  ;;  %vm309_vm4 = vweird.f32 %v1570_v62 }
 0x14f   :  { %v290_v45 = vsub.f32 1.0, %v289_v30  ;;  %v314_v30 = vand.u32 2147483648, %v272_v25  ;;  %vm310_vm6 = vmor %vm308_vm5, %vm309_vm4  ;;  %vm313_vm7 = vcmp.eq.f32.partialorder %v312_v2, 8.507059e+37 }
 0x150   :  { %v276_v47 = vmul.f32 %v1566_v27, %v275_v33  ;;  %v305_v53 = vsub.f32 1.0, %v304_v40 }
 0x151   :  { %v291_v50 = vmul.f32 %v1568_v29, %v290_v45  ;;  %v315_v33 = vor.u32 1.1754944e-38, %v314_v30 }
 0x152   :  { %v277_v58 = vadd.f32 %v1566_v27, %v276_v47  ;;  %v306_v34 = vmul.f32 %v1570_v62, %v305_v53 }
 0x153   :  { %v292_v61 = vadd.f32 %v1568_v29, %v291_v50 }
 0x154   :  { %v281_v60 = vsel %vm280_vm15, %v1566_v27, %v277_v58  ;;  %v307_v4 = vadd.f32 %v1570_v62, %v306_v34 }
 0x155   :  { %v286_v3 = vsel %vm283_vm1, %v285_v59, %v281_v60  ;;  %v296_v5 = vsel %vm295_vm2, %v1568_v29, %v292_v61 }
 0x156   :  { %v320_v24 = vmul.f32 %v1572_v63, %v286_v3  ;;  %v301_v26 = vsel %vm298_vm3, %v300_v54, %v296_v5  ;;  %v311_v27 = vsel %vm310_vm6, %v1570_v62, %v307_v4 }
 0x157   :  { %v319_v28 = vmul.f32 %v301_v26, %v1886_v55  ;;  %v316_v40 = vsel %vm313_vm7, %v315_v33, %v311_v27  ;;  %v327_v55 = vpop.permute.xlu1 %326 }
 0x158   :  { %v329_v62 = vmul.f32 %v327_v55, %v1805_v13  ;;  %v330_v45 = vmul.f32 %v327_v55, %v1807_v14  ;;  %v331_v47 = vmul.f32 %v327_v55, %v1809_v15 }
 0x159   :  { %v1927_v31 = vadd.f32 %v320_v24, %v319_v28 }
 0x15a   :  { %v333_v39 = vadd.f32 %v329_v62, %v1816_v18  ;;  %v334_v51 = vadd.f32 %v330_v45, %v1822_v21  ;;  %v335_v58 = vadd.f32 %v331_v47, %v1824_v22 }
 0x15b   :  { %1573 = vtanh.f32 %v1927_v31 }
 0x161   :  { %v1574_v29 = vpop.eup %1573 }
 0x162   :  { %v323_v41 = vmul.f32 %v1574_v29, %v316_v40 }
 0x164   :  { %375 = vperm.xlu0 %1499, %v323_v41   ;;  %351 = vperm.xlu1 %1497, %v323_v41  }
 0x165   :  { %339 = vperm.xlu2 %1496, %v323_v41  }
 0x16c   :  { %1500 = vset.pattern.permute.xlu1 %v1761_v52  ;;  %1504 = vset.pattern.permute.xlu0 %v1760_v48 }
 0x16d   :  { %1498 = vset.pattern.permute.xlu2 %v1760_v48  ;;  %387 = vperm.xlu1 %1500, %v323_v41  }
 0x16e   :  { %363 = vperm.xlu2 %1498, %v323_v41  }
 0x175   :  { %1502 = vset.pattern.permute.xlu1 %v1759_v0 }
 0x176   :  { %1501 = vset.pattern.permute.xlu2 %v1759_v0 }
 0x1bf   :  { %v340_v25 = vpop.permute.xlu2 %339 }
 0x1c0   :  { %v342_v50 = vmul.f32 %v340_v25, %v1793_v7  ;;  %v343_v56 = vmul.f32 %v340_v25, %v1795_v8  ;;  %v344_v53 = vmul.f32 %v340_v25, %v1797_v9 }
 0x1c2   :  { %v346_v60 = vadd.f32 %v342_v50, %v333_v39  ;;  %v347_v54 = vadd.f32 %v343_v56, %v334_v51  ;;  %v348_v63 = vadd.f32 %v344_v53, %v335_v58 }
 0x1c8   :  { %v364_v59 = vpop.permute.xlu2 %363 }
 0x1c9   :  { %v366_v26 = vmul.f32 %v364_v59, %v1811_v16  ;;  %v367_v34 = vmul.f32 %v364_v59, %v1818_v19  ;;  %v368_v28 = vmul.f32 %v364_v59, %v1820_v20 }
 0x1d6   :  { %v352_v61 = vpop.permute.xlu1 %351  ;;  %v376_v4 = vpop.permute.xlu0 %375 }
 0x1d7   :  { %v354_v3 = vmul.f32 %v352_v61, %v1799_v10  ;;  %v355_v5 = vmul.f32 %v352_v61, %v1801_v11  ;;  %v356_v24 = vmul.f32 %v352_v61, %v1803_v12  ;;  %v378_v41 = vmul.f32 %v376_v4, %v1838_v36 }
 0x1d8   :  { %v379_v62 = vmul.f32 %v376_v4, %v1840_v37  ;;  %v380_v45 = vmul.f32 %v376_v4, %v1842_v38 }
 0x1d9   :  { %v358_v30 = vadd.f32 %v354_v3, %v346_v60  ;;  %v359_v2 = vadd.f32 %v355_v5, %v347_v54  ;;  %v360_v27 = vadd.f32 %v356_v24, %v348_v63  ;;  %v332_v60 = vmul.f32 %v327_v55, %v1814_v17  ;;  %v31_v5 = vld [vmem:[%s2250_s0 + $0xc] sm:$0xf] }
 0x1da   :  { %463 = vperm.xlu2 %1501, %v31_v5  }
 0x1db   :  { %v370_v33 = vadd.f32 %v366_v26, %v358_v30  ;;  %v371_v29 = vadd.f32 %v367_v34, %v359_v2  ;;  %v372_v40 = vadd.f32 %v368_v28, %v360_v27  ;;  %v336_v28 = vadd.f32 %v332_v60, %v1855_v49 }
 0x1dc   :  { %v345_v30 = vmul.f32 %v340_v25, %v1862_v57  ;;  %v357_v2 = vmul.f32 %v352_v61, %v1870_v23  ;;  %v381_v25 = vmul.f32 %v376_v4, %v1879_v35 }
 0x1dd   :  { %v382_v39 = vadd.f32 %v378_v41, %v370_v33  ;;  %v383_v51 = vadd.f32 %v379_v62, %v371_v29  ;;  %v384_v50 = vadd.f32 %v380_v45, %v372_v40  ;;  %v369_v40 = vmul.f32 %v364_v59, %v1875_v32 }
 0x1de   :  { %v349_v55 = vadd.f32 %v345_v30, %v336_v28 }
 0x1df   :  { %v388_v47 = vpop.permute.xlu1 %387 }
 0x1e0   :  { %v390_v56 = vmul.f32 %v388_v47, %v1847_v42  ;;  %v391_v58 = vmul.f32 %v388_v47, %v1849_v43  ;;  %v392_v53 = vmul.f32 %v388_v47, %v1851_v44  ;;  %v361_v27 = vadd.f32 %v357_v2, %v349_v55 }
 0x1e1   :  { %v393_v61 = vmul.f32 %v388_v47, %v1883_v46 }
 0x1e2   :  { %v394_v54 = vadd.f32 %v390_v56, %v382_v39  ;;  %v395_v63 = vadd.f32 %v391_v58, %v383_v51  ;;  %v396_v3 = vadd.f32 %v392_v53, %v384_v50  ;;  %1503 = vset.pattern.permute.xlu2 %v1763_v6  ;;  %v373_v39 = vadd.f32 %v369_v40, %v361_v27 }
 0x1e4   :  { %v1456_v24 = vmul.f32 -1.442695, %v394_v54  ;;  %v1457_v26 = vmul.f32 -1.442695, %v395_v63  ;;  %v1458_v34 = vmul.f32 -1.442695, %v396_v3  ;;  %v385_v50 = vadd.f32 %v381_v25, %v373_v39 }
 0x1e6   :  { %1575 = vpow2.f32 %v1456_v24  ;;  %v397_v58 = vadd.f32 %v393_v61, %v385_v50 }
 0x1e7   :  { %1577 = vpow2.f32 %v1457_v26 }
 0x1e8   :  { %1579 = vpow2.f32 %v1458_v34 }
 0x1ec   :  { %v1576_v33 = vpop.eup %1575 }
 0x1ed   :  { %v1578_v29 = vpop.eup %1577  ;;  %v407_v41 = vadd.f32 1.0, %v1576_v33 }
 0x1ee   :  { %v1580_v62 = vpop.eup %1579  ;;  %v408_v45 = vadd.f32 1.0, %v1578_v29 }
 0x1ef   :  { %v409_v51 = vadd.f32 1.0, %v1580_v62  ;;  %1581 = vrcp.f32 %v407_v41  ;;  %v421_v5 = vand.u32 2147483648, %v407_v41  ;;  %v419_v34 = vand.u32 2147483647, %v407_v41 }
 0x1f0   :  { %1583 = vrcp.f32 %v408_v45  ;;  %v436_v28 = vand.u32 2147483648, %v408_v45  ;;  %v434_v47 = vand.u32 2147483647, %v408_v45  ;;  %vm415_vm10 = vweird.f32 %v407_v41 }
 0x1f1   :  { %1585 = vrcp.f32 %v409_v51  ;;  %v422_v55 = vor.u32 1.1754944e-38, %v421_v5  ;;  %vm430_vm12 = vweird.f32 %v408_v45  ;;  %vm420_vm13 = vcmp.eq.f32.partialorder %v419_v34, 8.507059e+37 }
 0x1f2   :  { %1587 = vtanh.f32 %v397_v58  ;;  %v437_v29 = vor.u32 1.1754944e-38, %v436_v28  ;;  %vm435_vm15 = vcmp.eq.f32.partialorder %v434_v47, 8.507059e+37  ;;  %vm445_vm1 = vweird.f32 %v409_v51  ;;  %v32_v47 = vld [vmem:[%s2250_s0 + $0x10] sm:$0xf] }
 0x1f5   :  { %v1582_v56 = vpop.eup %1581 }
 0x1f6   :  { %v1584_v53 = vpop.eup %1583  ;;  %v411_v60 = vmul.f32 %v1582_v56, %v407_v41  ;;  %vm416_vm8 = vweird.f32 %v1582_v56 }
 0x1f7   :  { %v1586_v54 = vpop.eup %1585  ;;  %v426_v63 = vmul.f32 %v1584_v53, %v408_v45  ;;  %vm431_vm9 = vweird.f32 %v1584_v53  ;;  %vm417_vm11 = vmor %vm415_vm10, %vm416_vm8  ;;  %v449_v45 = vand.u32 2147483647, %v409_v51 }
 0x1f8   :  { %v412_v59 = vsub.f32 1.0, %v411_v60  ;;  %v441_v3 = vmul.f32 %v1586_v54, %v409_v51  ;;  %vm432_vm14 = vmor %vm430_vm12, %vm431_vm9  ;;  %v1588_v40 = vpop.eup %1587  ;;  %vm446_vm0 = vweird.f32 %v1586_v54 }
 0x1f9   :  { %v427_v24 = vsub.f32 1.0, %v426_v63  ;;  %v451_v63 = vand.u32 2147483648, %v409_v51  ;;  %vm447_vm2 = vmor %vm445_vm1, %vm446_vm0  ;;  %vm450_vm3 = vcmp.eq.f32.partialorder %v449_v45, 8.507059e+37 }
 0x1fa   :  { %v413_v26 = vmul.f32 %v1582_v56, %v412_v59  ;;  %v442_v2 = vsub.f32 1.0, %v441_v3 }
 0x1fb   :  { %v428_v4 = vmul.f32 %v1584_v53, %v427_v24  ;;  %v452_v59 = vor.u32 1.1754944e-38, %v451_v63 }
 0x1fc   :  { %v414_v30 = vadd.f32 %v1582_v56, %v413_v26  ;;  %v443_v50 = vmul.f32 %v1586_v54, %v442_v2 }
 0x1fd   :  { %v429_v27 = vadd.f32 %v1584_v53, %v428_v4 }
 0x1fe   :  { %v418_v33 = vsel %vm417_vm11, %v1582_v56, %v414_v30  ;;  %v444_v41 = vadd.f32 %v1586_v54, %v443_v50 }
 0x1ff   :  { %v423_v62 = vsel %vm420_vm13, %v422_v55, %v418_v33  ;;  %v433_v39 = vsel %vm432_vm14, %v1584_v53, %v429_v27 }
 0x200   :  { %v438_v25 = vsel %vm435_vm15, %v437_v29, %v433_v39  ;;  %v457_v61 = vmul.f32 %v1588_v40, %v423_v62  ;;  %v448_v56 = vsel %vm447_vm2, %v1586_v54, %v444_v41 }
 0x201   :  { %v456_v58 = vmul.f32 %v438_v25, %v1927_v31  ;;  %v453_v3 = vsel %vm450_vm3, %v452_v59, %v448_v56 }
 0x203   :  { %v1968_v60 = vadd.f32 %v457_v61, %v456_v58 }
 0x205   :  { %1589 = vtanh.f32 %v1968_v60 }
 0x20b   :  { %v1590_v53 = vpop.eup %1589 }
 0x20c   :  { %v460_v5 = vmul.f32 %v1590_v53, %v453_v3 }
 0x20e   :  { %500 = vperm.xlu0 %1504, %v460_v5   ;;  %488 = vperm.xlu2 %1503, %v460_v5  }
 0x20f   :  { %476 = vperm.xlu1 %1502, %v460_v5  }
 0x216   :  { %1506 = vset.pattern.permute.xlu2 %v1761_v52  ;;  %1509 = vset.pattern.permute.xlu0 %v1763_v6 }
 0x217   :  { %1505 = vset.pattern.permute.xlu1 %v1762_v1  ;;  %524 = vperm.xlu2 %1506, %v460_v5  }
 0x218   :  { %512 = vperm.xlu1 %1505, %v460_v5  }
 0x21f   :  { %1508 = vset.pattern.permute.xlu2 %v1759_v0 }
 0x220   :  { %1507 = vset.pattern.permute.xlu1 %v1759_v0 }
 0x221   :  { %600 = vperm.xlu1 %1507, %v32_v47  }
 0x229   :  { %1510 = vset.pattern.permute.xlu1 %v1760_v48 }
 0x234   :  { %v464_v31 = vpop.permute.xlu2 %463 }
 0x235   :  { %v466_v51 = vmul.f32 %v464_v31, %v1805_v13  ;;  %v467_v54 = vmul.f32 %v464_v31, %v1807_v14  ;;  %v468_v24 = vmul.f32 %v464_v31, %v1809_v15 }
 0x237   :  { %v470_v34 = vadd.f32 %v466_v51, %v1816_v18  ;;  %v471_v28 = vadd.f32 %v467_v54, %v1822_v21  ;;  %v472_v30 = vadd.f32 %v468_v24, %v1824_v22 }
 0x268   :  { %v489_v26 = vpop.permute.xlu2 %488 }
 0x269   :  { %v491_v33 = vmul.f32 %v489_v26, %v1799_v10  ;;  %v492_v29 = vmul.f32 %v489_v26, %v1801_v11  ;;  %v493_v25 = vmul.f32 %v489_v26, %v1803_v12 }
 0x271   :  { %v525_v56 = vpop.permute.xlu2 %524 }
 0x272   :  { %v528_v47 = vmul.f32 %v525_v56, %v1849_v43 }
 0x280   :  { %v501_v61 = vpop.permute.xlu0 %500 }
 0x281   :  { %v477_v4 = vpop.permute.xlu1 %476  ;;  %v503_v63 = vmul.f32 %v501_v61, %v1811_v16  ;;  %v504_v45 = vmul.f32 %v501_v61, %v1818_v19  ;;  %v505_v59 = vmul.f32 %v501_v61, %v1820_v20 }
 0x282   :  { %v479_v2 = vmul.f32 %v477_v4, %v1793_v7  ;;  %v480_v55 = vmul.f32 %v477_v4, %v1795_v8  ;;  %v481_v27 = vmul.f32 %v477_v4, %v1797_v9 }
 0x284   :  { %v483_v40 = vadd.f32 %v479_v2, %v470_v34  ;;  %v484_v62 = vadd.f32 %v480_v55, %v471_v28  ;;  %v485_v39 = vadd.f32 %v481_v27, %v472_v30  ;;  %v527_v28 = vmul.f32 %v525_v56, %v1847_v42 }
 0x285   :  { %v529_v30 = vmul.f32 %v525_v56, %v1851_v44 }
 0x286   :  { %v495_v50 = vadd.f32 %v491_v33, %v483_v40  ;;  %v496_v58 = vadd.f32 %v492_v29, %v484_v62  ;;  %v497_v41 = vadd.f32 %v493_v25, %v485_v39  ;;  %v469_v33 = vmul.f32 %v464_v31, %v1814_v17 }
 0x287   :  { %v482_v39 = vmul.f32 %v477_v4, %v1862_v57  ;;  %v506_v31 = vmul.f32 %v501_v61, %v1875_v32 }
 0x288   :  { %v507_v3 = vadd.f32 %v503_v63, %v495_v50  ;;  %v508_v5 = vadd.f32 %v504_v45, %v496_v58  ;;  %v509_v51 = vadd.f32 %v505_v59, %v497_v41  ;;  %v473_v41 = vadd.f32 %v469_v33, %v1855_v49 }
 0x289   :  { %v494_v45 = vmul.f32 %v489_v26, %v1870_v23 }
 0x28a   :  { %v513_v53 = vpop.permute.xlu1 %512  ;;  %v486_v63 = vadd.f32 %v482_v39, %v473_v41 }
 0x28b   :  { %v515_v54 = vmul.f32 %v513_v53, %v1838_v36  ;;  %v516_v24 = vmul.f32 %v513_v53, %v1840_v37  ;;  %v517_v34 = vmul.f32 %v513_v53, %v1842_v38 }
 0x28c   :  { %v498_v59 = vadd.f32 %v494_v45, %v486_v63 }
 0x28d   :  { %v519_v2 = vadd.f32 %v515_v54, %v507_v3  ;;  %v520_v55 = vadd.f32 %v516_v24, %v508_v5  ;;  %v521_v27 = vadd.f32 %v517_v34, %v509_v51  ;;  %v518_v51 = vmul.f32 %v513_v53, %v1879_v35 }
 0x28e   :  { %v510_v34 = vadd.f32 %v506_v31, %v498_v59 }
 0x28f   :  { %v531_v29 = vadd.f32 %v527_v28, %v519_v2  ;;  %v532_v40 = vadd.f32 %v528_v47, %v520_v55  ;;  %v533_v62 = vadd.f32 %v529_v30, %v521_v27  ;;  %v530_v30 = vmul.f32 %v525_v56, %v1883_v46 }
 0x290   :  { %v522_v47 = vadd.f32 %v518_v51, %v510_v34 }
 0x291   :  { %v1459_v25 = vmul.f32 -1.442695, %v531_v29  ;;  %v1460_v50 = vmul.f32 -1.442695, %v532_v40  ;;  %v1461_v58 = vmul.f32 -1.442695, %v533_v62 }
 0x292   :  { %v534_v26 = vadd.f32 %v530_v30, %v522_v47 }
 0x293   :  { %1591 = vpow2.f32 %v1459_v25 }
 0x294   :  { %1593 = vpow2.f32 %v1460_v50 }
 0x295   :  { %1595 = vpow2.f32 %v1461_v58 }
 0x299   :  { %v1592_v3 = vpop.eup %1591 }
 0x29a   :  { %v1594_v5 = vpop.eup %1593  ;;  %v544_v54 = vadd.f32 1.0, %v1592_v3 }
 0x29b   :  { %v1596_v4 = vpop.eup %1595  ;;  %v545_v24 = vadd.f32 1.0, %v1594_v5 }
 0x29c   :  { %v546_v28 = vadd.f32 1.0, %v1596_v4  ;;  %1597 = vrcp.f32 %v544_v54  ;;  %v558_v53 = vand.u32 2147483648, %v544_v54  ;;  %v556_v25 = vand.u32 2147483647, %v544_v54 }
 0x29d   :  { %1599 = vrcp.f32 %v545_v24  ;;  %v573_v50 = vand.u32 2147483648, %v545_v24  ;;  %v571_v41 = vand.u32 2147483647, %v545_v24  ;;  %vm552_vm6 = vweird.f32 %v544_v54 }
 0x29e   :  { %1601 = vrcp.f32 %v546_v28  ;;  %v559_v45 = vor.u32 1.1754944e-38, %v558_v53  ;;  %vm567_vm8 = vweird.f32 %v545_v24  ;;  %vm557_vm9 = vcmp.eq.f32.partialorder %v556_v25, 8.507059e+37 }
 0x29f   :  { %1603 = vtanh.f32 %v534_v26  ;;  %v574_v5 = vor.u32 1.1754944e-38, %v573_v50  ;;  %vm572_vm11 = vcmp.eq.f32.partialorder %v571_v41, 8.507059e+37  ;;  %vm582_vm13 = vweird.f32 %v546_v28 }
 0x2a2   :  { %v1598_v2 = vpop.eup %1597 }
 0x2a3   :  { %v1600_v55 = vpop.eup %1599  ;;  %v548_v27 = vmul.f32 %v1598_v2, %v544_v54  ;;  %vm553_vm4 = vweird.f32 %v1598_v2 }
 0x2a4   :  { %v1602_v33 = vpop.eup %1601  ;;  %v563_v29 = vmul.f32 %v1600_v55, %v545_v24  ;;  %vm568_vm5 = vweird.f32 %v1600_v55  ;;  %vm554_vm7 = vmor %vm552_vm6, %vm553_vm4  ;;  %v586_v24 = vand.u32 2147483647, %v546_v28 }
 0x2a5   :  { %v549_v61 = vsub.f32 1.0, %v548_v27  ;;  %v578_v40 = vmul.f32 %v1602_v33, %v546_v28  ;;  %vm569_vm10 = vmor %vm567_vm8, %vm568_vm5  ;;  %v1604_v31 = vpop.eup %1603  ;;  %vm583_vm12 = vweird.f32 %v1602_v33 }
 0x2a6   :  { %v564_v62 = vsub.f32 1.0, %v563_v29  ;;  %v588_v29 = vand.u32 2147483648, %v546_v28  ;;  %vm584_vm14 = vmor %vm582_vm13, %vm583_vm12  ;;  %vm587_vm15 = vcmp.eq.f32.partialorder %v586_v24, 8.507059e+37 }
 0x2a7   :  { %v550_v39 = vmul.f32 %v1598_v2, %v549_v61  ;;  %v579_v56 = vsub.f32 1.0, %v578_v40 }
 0x2a8   :  { %v565_v58 = vmul.f32 %v1600_v55, %v564_v62  ;;  %v589_v61 = vor.u32 1.1754944e-38, %v588_v29 }
 0x2a9   :  { %v551_v63 = vadd.f32 %v1598_v2, %v550_v39  ;;  %v580_v30 = vmul.f32 %v1602_v33, %v579_v56 }
 0x2aa   :  { %v566_v59 = vadd.f32 %v1600_v55, %v565_v58 }
 0x2ab   :  { %v555_v3 = vsel %vm554_vm7, %v1598_v2, %v551_v63  ;;  %v581_v54 = vadd.f32 %v1602_v33, %v580_v30 }
 0x2ac   :  { %v560_v51 = vsel %vm557_vm9, %v559_v45, %v555_v3  ;;  %v570_v4 = vsel %vm569_vm10, %v1600_v55, %v566_v59 }
 0x2ad   :  { %v575_v34 = vsel %vm572_vm11, %v574_v5, %v570_v4  ;;  %v594_v47 = vmul.f32 %v1604_v31, %v560_v51  ;;  %v585_v2 = vsel %vm584_vm14, %v1602_v33, %v581_v54 }
 0x2ae   :  { %v593_v26 = vmul.f32 %v575_v34, %v1968_v60  ;;  %v590_v40 = vsel %vm587_vm15, %v589_v61, %v585_v2  ;;  %v601_v60 = vpop.permute.xlu1 %600 }
 0x2af   :  { %v603_v28 = vmul.f32 %v601_v60, %v1805_v13  ;;  %v604_v33 = vmul.f32 %v601_v60, %v1807_v14  ;;  %v605_v62 = vmul.f32 %v601_v60, %v1809_v15 }
 0x2b0   :  { %v2009_v27 = vadd.f32 %v594_v47, %v593_v26 }
 0x2b1   :  { %v607_v25 = vadd.f32 %v603_v28, %v1816_v18  ;;  %v608_v50 = vadd.f32 %v604_v33, %v1822_v21  ;;  %v609_v63 = vadd.f32 %v605_v62, %v1824_v22 }
 0x2b2   :  { %1605 = vtanh.f32 %v2009_v27 }
 0x2b8   :  { %v1606_v55 = vpop.eup %1605 }
 0x2b9   :  { %v597_v53 = vmul.f32 %v1606_v55, %v590_v40 }
 0x2bb   :  { %637 = vperm.xlu1 %1510, %v597_v53   ;;  %625 = vperm.xlu0 %1509, %v597_v53  }
 0x2bc   :  { %613 = vperm.xlu2 %1508, %v597_v53  }
 0x2c3   :  { %1512 = vset.pattern.permute.xlu1 %v1761_v52  ;;  %1514 = vset.pattern.permute.xlu0 %v1759_v0 }
 0x2c4   :  { %1511 = vset.pattern.permute.xlu2 %v1762_v1  ;;  %661 = vperm.xlu1 %1512, %v597_v53  }
 0x2c5   :  { %649 = vperm.xlu2 %1511, %v597_v53  }
 0x2cc   :  { %1515 = vset.pattern.permute.xlu1 %v1763_v6 }
 0x2cd   :  { %1513 = vset.pattern.permute.xlu2 %v1759_v0 }
 0x316   :  { %v614_v39 = vpop.permute.xlu2 %613 }
 0x317   :  { %v616_v58 = vmul.f32 %v614_v39, %v1793_v7  ;;  %v617_v41 = vmul.f32 %v614_v39, %v1795_v8  ;;  %v618_v56 = vmul.f32 %v614_v39, %v1797_v9 }
 0x319   :  { %v620_v3 = vadd.f32 %v616_v58, %v607_v25  ;;  %v621_v5 = vadd.f32 %v617_v41, %v608_v50  ;;  %v622_v31 = vadd.f32 %v618_v56, %v609_v63 }
 0x31f   :  { %v650_v26 = vpop.permute.xlu2 %649 }
 0x320   :  { %v652_v53 = vmul.f32 %v650_v26, %v1838_v36  ;;  %v653_v28 = vmul.f32 %v650_v26, %v1840_v37  ;;  %v654_v33 = vmul.f32 %v650_v26, %v1842_v38 }
 0x32d   :  { %v638_v45 = vpop.permute.xlu1 %637  ;;  %v626_v59 = vpop.permute.xlu0 %625 }
 0x32e   :  { %v628_v51 = vmul.f32 %v626_v59, %v1799_v10  ;;  %v629_v4 = vmul.f32 %v626_v59, %v1801_v11  ;;  %v630_v34 = vmul.f32 %v626_v59, %v1803_v12  ;;  %v640_v47 = vmul.f32 %v638_v45, %v1811_v16 }
 0x32f   :  { %v641_v30 = vmul.f32 %v638_v45, %v1818_v19  ;;  %v642_v54 = vmul.f32 %v638_v45, %v1820_v20 }
 0x330   :  { %v632_v29 = vadd.f32 %v628_v51, %v620_v3  ;;  %v633_v24 = vadd.f32 %v629_v4, %v621_v5  ;;  %v634_v2 = vadd.f32 %v630_v34, %v622_v31  ;;  %v606_v3 = vmul.f32 %v601_v60, %v1814_v17  ;;  %v33_v4 = vld [vmem:[%s2250_s0 + $0x14] sm:$0xf] }
 0x331   :  { %737 = vperm.xlu2 %1513, %v33_v4  }
 0x332   :  { %v644_v61 = vadd.f32 %v640_v47, %v632_v29  ;;  %v645_v55 = vadd.f32 %v641_v30, %v633_v24  ;;  %v646_v40 = vadd.f32 %v642_v54, %v634_v2  ;;  %v610_v54 = vadd.f32 %v606_v3, %v1855_v49 }
 0x333   :  { %v619_v29 = vmul.f32 %v614_v39, %v1862_v57  ;;  %v631_v24 = vmul.f32 %v626_v59, %v1870_v23  ;;  %v655_v39 = vmul.f32 %v650_v26, %v1879_v35 }
 0x334   :  { %v656_v25 = vadd.f32 %v652_v53, %v644_v61  ;;  %v657_v50 = vadd.f32 %v653_v28, %v645_v55  ;;  %v658_v58 = vadd.f32 %v654_v33, %v646_v40  ;;  %v643_v40 = vmul.f32 %v638_v45, %v1875_v32 }
 0x335   :  { %v623_v60 = vadd.f32 %v619_v29, %v610_v54 }
 0x336   :  { %v662_v62 = vpop.permute.xlu1 %661 }
 0x337   :  { %v664_v41 = vmul.f32 %v662_v62, %v1847_v42  ;;  %v665_v63 = vmul.f32 %v662_v62, %v1849_v43  ;;  %v666_v56 = vmul.f32 %v662_v62, %v1851_v44  ;;  %v635_v2 = vadd.f32 %v631_v24, %v623_v60 }
 0x338   :  { %v667_v59 = vmul.f32 %v662_v62, %v1883_v46 }
 0x339   :  { %v668_v5 = vadd.f32 %v664_v41, %v656_v25  ;;  %v669_v31 = vadd.f32 %v665_v63, %v657_v50  ;;  %v670_v51 = vadd.f32 %v666_v56, %v658_v58  ;;  %1516 = vset.pattern.permute.xlu2 %v1760_v48  ;;  %v647_v25 = vadd.f32 %v643_v40, %v635_v2 }
 0x33b   :  { %v1462_v34 = vmul.f32 -1.442695, %v668_v5  ;;  %v1463_v47 = vmul.f32 -1.442695, %v669_v31  ;;  %v1464_v30 = vmul.f32 -1.442695, %v670_v51  ;;  %v659_v58 = vadd.f32 %v655_v39, %v647_v25 }
 0x33d   :  { %1607 = vpow2.f32 %v1462_v34  ;;  %v671_v63 = vadd.f32 %v667_v59, %v659_v58 }
 0x33e   :  { %1609 = vpow2.f32 %v1463_v47 }
 0x33f   :  { %1611 = vpow2.f32 %v1464_v30 }
 0x343   :  { %v1608_v61 = vpop.eup %1607 }
 0x344   :  { %v1610_v55 = vpop.eup %1609  ;;  %v681_v53 = vadd.f32 1.0, %v1608_v61 }
 0x345   :  { %v1612_v28 = vpop.eup %1611  ;;  %v682_v33 = vadd.f32 1.0, %v1610_v55 }
 0x346   :  { %v683_v50 = vadd.f32 1.0, %v1612_v28  ;;  %1613 = vrcp.f32 %v681_v53  ;;  %v695_v4 = vand.u32 2147483648, %v681_v53  ;;  %v693_v30 = vand.u32 2147483647, %v681_v53 }
 0x347   :  { %1615 = vrcp.f32 %v682_v33  ;;  %v710_v54 = vand.u32 2147483648, %v682_v33  ;;  %v708_v62 = vand.u32 2147483647, %v682_v33  ;;  %vm689_vm2 = vweird.f32 %v681_v53 }
 0x348   :  { %1617 = vrcp.f32 %v683_v50  ;;  %v696_v60 = vor.u32 1.1754944e-38, %v695_v4  ;;  %vm704_vm4 = vweird.f32 %v682_v33  ;;  %vm694_vm5 = vcmp.eq.f32.partialorder %v693_v30, 8.507059e+37 }
 0x349   :  { %1619 = vtanh.f32 %v671_v63  ;;  %v711_v55 = vor.u32 1.1754944e-38, %v710_v54  ;;  %vm709_vm7 = vcmp.eq.f32.partialorder %v708_v62, 8.507059e+37  ;;  %vm719_vm9 = vweird.f32 %v683_v50 }
 0x34c   :  { %v1614_v41 = vpop.eup %1613 }
 0x34d   :  { %v1616_v56 = vpop.eup %1615  ;;  %v685_v3 = vmul.f32 %v1614_v41, %v681_v53  ;;  %vm690_vm0 = vweird.f32 %v1614_v41 }
 0x34e   :  { %v1618_v5 = vpop.eup %1617  ;;  %v700_v31 = vmul.f32 %v1616_v56, %v682_v33  ;;  %vm705_vm1 = vweird.f32 %v1616_v56  ;;  %vm691_vm3 = vmor %vm689_vm2, %vm690_vm0  ;;  %v723_v33 = vand.u32 2147483647, %v683_v50 }
 0x34f   :  { %v686_v45 = vsub.f32 1.0, %v685_v3  ;;  %v715_v51 = vmul.f32 %v1618_v5, %v683_v50  ;;  %vm706_vm6 = vmor %vm704_vm4, %vm705_vm1  ;;  %v1620_v40 = vpop.eup %1619  ;;  %vm720_vm8 = vweird.f32 %v1618_v5 }
 0x350   :  { %v701_v34 = vsub.f32 1.0, %v700_v31  ;;  %v725_v31 = vand.u32 2147483648, %v683_v50  ;;  %vm721_vm10 = vmor %vm719_vm9, %vm720_vm8  ;;  %vm724_vm11 = vcmp.eq.f32.partialorder %v723_v33, 8.507059e+37 }
 0x351   :  { %v687_v47 = vmul.f32 %v1614_v41, %v686_v45  ;;  %v716_v24 = vsub.f32 1.0, %v715_v51 }
 0x352   :  { %v702_v26 = vmul.f32 %v1616_v56, %v701_v34  ;;  %v726_v45 = vor.u32 1.1754944e-38, %v725_v31 }
 0x353   :  { %v688_v29 = vadd.f32 %v1614_v41, %v687_v47  ;;  %v717_v58 = vmul.f32 %v1618_v5, %v716_v24 }
 0x354   :  { %v703_v2 = vadd.f32 %v1616_v56, %v702_v26 }
 0x355   :  { %v692_v61 = vsel %vm691_vm3, %v1614_v41, %v688_v29  ;;  %v718_v53 = vadd.f32 %v1618_v5, %v717_v58 }
 0x356   :  { %v697_v28 = vsel %vm694_vm5, %v696_v60, %v692_v61  ;;  %v707_v25 = vsel %vm706_vm6, %v1616_v56, %v703_v2 }
 0x357   :  { %v712_v39 = vsel %vm709_vm7, %v711_v55, %v707_v25  ;;  %v731_v59 = vmul.f32 %v1620_v40, %v697_v28  ;;  %v722_v41 = vsel %vm721_vm10, %v1618_v5, %v718_v53 }
 0x358   :  { %v730_v63 = vmul.f32 %v712_v39, %v2009_v27  ;;  %v727_v51 = vsel %vm724_vm11, %v726_v45, %v722_v41  ;;  %v34_v27 = vld [vmem:[%s2250_s0 + $0x18] sm:$0xf] }
 0x35a   :  { %v2050_v3 = vadd.f32 %v731_v59, %v730_v63 }
 0x35c   :  { %1621 = vtanh.f32 %v2050_v3 }
 0x362   :  { %v1622_v56 = vpop.eup %1621 }
 0x363   :  { %v734_v4 = vmul.f32 %v1622_v56, %v727_v51 }
 0x365   :  { %774 = vperm.xlu2 %1516, %v734_v4   ;;  %762 = vperm.xlu1 %1515, %v734_v4  }
 0x366   :  { %750 = vperm.xlu0 %1514, %v734_v4  }
 0x36d   :  { %1518 = vset.pattern.permute.xlu2 %v1761_v52  ;;  %1517 = vset.pattern.permute.xlu1 %v1762_v1 }
 0x36e   :  { %874 = vperm.xlu0 %1514, %v34_v27   ;;  %798 = vperm.xlu2 %1518, %v734_v4  }
 0x36f   :  { %786 = vperm.xlu1 %1517, %v734_v4  }
 0x376   :  { %1520 = vset.pattern.permute.xlu2 %v1763_v6  ;;  %1521 = vset.pattern.permute.xlu0 %v1760_v48 }
 0x377   :  { %1519 = vset.pattern.permute.xlu1 %v1759_v0 }
 0x38b   :  { %v738_v50 = vpop.permute.xlu2 %737 }
 0x38c   :  { %v740_v5 = vmul.f32 %v738_v50, %v1805_v13  ;;  %v741_v34 = vmul.f32 %v738_v50, %v1807_v14  ;;  %v742_v47 = vmul.f32 %v738_v50, %v1809_v15 }
 0x38e   :  { %v744_v26 = vadd.f32 %v740_v5, %v1816_v18  ;;  %v745_v62 = vadd.f32 %v741_v34, %v1822_v21  ;;  %v746_v24 = vadd.f32 %v742_v47, %v1824_v22 }
 0x3bf   :  { %v775_v30 = vpop.permute.xlu2 %774 }
 0x3c0   :  { %v777_v31 = vmul.f32 %v775_v30, %v1811_v16  ;;  %v778_v33 = vmul.f32 %v775_v30, %v1818_v19  ;;  %v779_v41 = vmul.f32 %v775_v30, %v1820_v20 }
 0x3c8   :  { %v799_v45 = vpop.permute.xlu2 %798 }
 0x3d7   :  { %v763_v54 = vpop.permute.xlu1 %762 }
 0x3d8   :  { %v751_v29 = vpop.permute.xlu0 %750  ;;  %v765_v55 = vmul.f32 %v763_v54, %v1799_v10  ;;  %v766_v40 = vmul.f32 %v763_v54, %v1801_v11  ;;  %v767_v59 = vmul.f32 %v763_v54, %v1803_v12 }
 0x3d9   :  { %v753_v60 = vmul.f32 %v751_v29, %v1793_v7  ;;  %v754_v2 = vmul.f32 %v751_v29, %v1795_v8  ;;  %v755_v61 = vmul.f32 %v751_v29, %v1797_v9 }
 0x3db   :  { %v757_v28 = vadd.f32 %v753_v60, %v744_v26  ;;  %v758_v25 = vadd.f32 %v754_v2, %v745_v62  ;;  %v759_v39 = vadd.f32 %v755_v61, %v746_v24  ;;  %v801_v26 = vmul.f32 %v799_v45, %v1847_v42 }
 0x3dc   :  { %v802_v62 = vmul.f32 %v799_v45, %v1849_v43  ;;  %v803_v24 = vmul.f32 %v799_v45, %v1851_v44 }
 0x3dd   :  { %v769_v58 = vadd.f32 %v765_v55, %v757_v28  ;;  %v770_v63 = vadd.f32 %v766_v40, %v758_v25  ;;  %v771_v53 = vadd.f32 %v767_v59, %v759_v39  ;;  %v743_v55 = vmul.f32 %v738_v50, %v1814_v17 }
 0x3de   :  { %v756_v39 = vmul.f32 %v751_v29, %v1862_v57  ;;  %v780_v50 = vmul.f32 %v775_v30, %v1875_v32 }
 0x3df   :  { %v781_v51 = vadd.f32 %v777_v31, %v769_v58  ;;  %v782_v4 = vadd.f32 %v778_v33, %v770_v63  ;;  %v783_v27 = vadd.f32 %v779_v41, %v771_v53  ;;  %v747_v53 = vadd.f32 %v743_v55, %v1855_v49 }
 0x3e0   :  { %v768_v33 = vmul.f32 %v763_v54, %v1870_v23 }
 0x3e1   :  { %v787_v56 = vpop.permute.xlu1 %786  ;;  %v760_v31 = vadd.f32 %v756_v39, %v747_v53 }
 0x3e2   :  { %v789_v5 = vmul.f32 %v787_v56, %v1838_v36  ;;  %v790_v34 = vmul.f32 %v787_v56, %v1840_v37  ;;  %v791_v47 = vmul.f32 %v787_v56, %v1842_v38 }
 0x3e3   :  { %v772_v41 = vadd.f32 %v768_v33, %v760_v31 }
 0x3e4   :  { %v793_v60 = vadd.f32 %v789_v5, %v781_v51  ;;  %v794_v2 = vadd.f32 %v790_v34, %v782_v4  ;;  %v795_v61 = vadd.f32 %v791_v47, %v783_v27  ;;  %v792_v27 = vmul.f32 %v787_v56, %v1879_v35 }
 0x3e5   :  { %v784_v47 = vadd.f32 %v780_v50, %v772_v41 }
 0x3e6   :  { %v805_v40 = vadd.f32 %v801_v26, %v793_v60  ;;  %v806_v28 = vadd.f32 %v802_v62, %v794_v2  ;;  %v807_v25 = vadd.f32 %v803_v24, %v795_v61  ;;  %v804_v24 = vmul.f32 %v799_v45, %v1883_v46 }
 0x3e7   :  { %v796_v62 = vadd.f32 %v792_v27, %v784_v47 }
 0x3e8   :  { %v1465_v59 = vmul.f32 -1.442695, %v805_v40  ;;  %v1466_v58 = vmul.f32 -1.442695, %v806_v28  ;;  %v1467_v63 = vmul.f32 -1.442695, %v807_v25 }
 0x3e9   :  { %v808_v54 = vadd.f32 %v804_v24, %v796_v62 }
 0x3ea   :  { %1623 = vpow2.f32 %v1465_v59 }
 0x3eb   :  { %1625 = vpow2.f32 %v1466_v58 }
 0x3ec   :  { %1627 = vpow2.f32 %v1467_v63 }
 0x3f0   :  { %v1624_v51 = vpop.eup %1623 }
 0x3f1   :  { %v1626_v4 = vpop.eup %1625  ;;  %v818_v5 = vadd.f32 1.0, %v1624_v51 }
 0x3f2   :  { %v1628_v29 = vpop.eup %1627  ;;  %v819_v34 = vadd.f32 1.0, %v1626_v4 }
 0x3f3   :  { %v820_v26 = vadd.f32 1.0, %v1628_v29  ;;  %1629 = vrcp.f32 %v818_v5  ;;  %v832_v56 = vand.u32 2147483648, %v818_v5  ;;  %v830_v59 = vand.u32 2147483647, %v818_v5 }
 0x3f4   :  { %1631 = vrcp.f32 %v819_v34  ;;  %v847_v58 = vand.u32 2147483648, %v819_v34  ;;  %v845_v53 = vand.u32 2147483647, %v819_v34  ;;  %vm826_vm14 = vweird.f32 %v818_v5 }
 0x3f5   :  { %1633 = vrcp.f32 %v820_v26  ;;  %v833_v33 = vor.u32 1.1754944e-38, %v832_v56  ;;  %vm841_vm0 = vweird.f32 %v819_v34  ;;  %vm831_vm1 = vcmp.eq.f32.partialorder %v830_v59, 8.507059e+37 }
 0x3f6   :  { %1635 = vtanh.f32 %v808_v54  ;;  %v848_v4 = vor.u32 1.1754944e-38, %v847_v58  ;;  %vm846_vm3 = vcmp.eq.f32.partialorder %v845_v53, 8.507059e+37  ;;  %vm856_vm5 = vweird.f32 %v820_v26  ;;  %v35_v53 = vld [vmem:[%s2250_s0 + $0x1c] sm:$0xf] }
 0x3f9   :  { %v1630_v60 = vpop.eup %1629 }
 0x3fa   :  { %v1632_v2 = vpop.eup %1631  ;;  %v822_v61 = vmul.f32 %v1630_v60, %v818_v5  ;;  %vm827_vm12 = vweird.f32 %v1630_v60 }
 0x3fb   :  { %v1634_v55 = vpop.eup %1633  ;;  %v837_v40 = vmul.f32 %v1632_v2, %v819_v34  ;;  %vm842_vm13 = vweird.f32 %v1632_v2  ;;  %vm828_vm15 = vmor %vm826_vm14, %vm827_vm12  ;;  %v860_v34 = vand.u32 2147483647, %v820_v26 }
 0x3fc   :  { %v823_v30 = vsub.f32 1.0, %v822_v61  ;;  %v852_v28 = vmul.f32 %v1634_v55, %v820_v26  ;;  %vm843_vm2 = vmor %vm841_vm0, %vm842_vm13  ;;  %v1636_v50 = vpop.eup %1635  ;;  %vm857_vm4 = vweird.f32 %v1634_v55 }
 0x3fd   :  { %v838_v25 = vsub.f32 1.0, %v837_v40  ;;  %v862_v40 = vand.u32 2147483648, %v820_v26  ;;  %vm858_vm6 = vmor %vm856_vm5, %vm857_vm4  ;;  %vm861_vm7 = vcmp.eq.f32.partialorder %v860_v34, 8.507059e+37 }
 0x3fe   :  { %v824_v39 = vmul.f32 %v1630_v60, %v823_v30  ;;  %v853_v45 = vsub.f32 1.0, %v852_v28 }
 0x3ff   :  { %v839_v63 = vmul.f32 %v1632_v2, %v838_v25  ;;  %v863_v30 = vor.u32 1.1754944e-38, %v862_v40 }
 0x400   :  { %v825_v31 = vadd.f32 %v1630_v60, %v824_v39  ;;  %v854_v24 = vmul.f32 %v1634_v55, %v853_v45 }
 0x401   :  { %v840_v41 = vadd.f32 %v1632_v2, %v839_v63 }
 0x402   :  { %v829_v51 = vsel %vm828_vm15, %v1630_v60, %v825_v31  ;;  %v855_v5 = vadd.f32 %v1634_v55, %v854_v24 }
 0x403   :  { %v834_v27 = vsel %vm831_vm1, %v833_v33, %v829_v51  ;;  %v844_v29 = vsel %vm843_vm2, %v1632_v2, %v840_v41 }
 0x404   :  { %v849_v47 = vsel %vm846_vm3, %v848_v4, %v844_v29  ;;  %v868_v62 = vmul.f32 %v1636_v50, %v834_v27  ;;  %v859_v60 = vsel %vm858_vm6, %v1634_v55, %v855_v5 }
 0x405   :  { %v867_v54 = vmul.f32 %v849_v47, %v2050_v3  ;;  %v864_v28 = vsel %vm861_vm7, %v863_v30, %v859_v60  ;;  %v875_v3 = vpop.permute.xlu0 %874 }
 0x406   :  { %v877_v26 = vmul.f32 %v875_v3, %v1805_v13  ;;  %v878_v55 = vmul.f32 %v875_v3, %v1807_v14  ;;  %v879_v25 = vmul.f32 %v875_v3, %v1809_v15 }
 0x407   :  { %v2090_v61 = vadd.f32 %v868_v62, %v867_v54 }
 0x408   :  { %v881_v59 = vadd.f32 %v877_v26, %v1816_v18  ;;  %v882_v58 = vadd.f32 %v878_v55, %v1822_v21  ;;  %v883_v31 = vadd.f32 %v879_v25, %v1824_v22 }
 0x409   :  { %1637 = vtanh.f32 %v2090_v61 }
 0x40f   :  { %v1638_v2 = vpop.eup %1637 }
 0x410   :  { %v871_v56 = vmul.f32 %v1638_v2, %v864_v28 }
 0x412   :  { %911 = vperm.xlu0 %1521, %v871_v56   ;;  %899 = vperm.xlu2 %1520, %v871_v56  }
 0x413   :  { %887 = vperm.xlu1 %1519, %v871_v56  }
 0x41a   :  { %1523 = vset.pattern.permute.xlu2 %v1761_v52  ;;  %1526 = vset.pattern.permute.xlu0 %v1763_v6 }
 0x41b   :  { %1522 = vset.pattern.permute.xlu1 %v1762_v1  ;;  %935 = vperm.xlu2 %1523, %v871_v56  }
 0x41c   :  { %923 = vperm.xlu1 %1522, %v871_v56  }
 0x423   :  { %1525 = vset.pattern.permute.xlu2 %v1759_v0 }
 0x424   :  { %1524 = vset.pattern.permute.xlu1 %v1759_v0 }
 0x425   :  { %1011 = vperm.xlu1 %1524, %v35_v53  }
 0x42d   :  { %1527 = vset.pattern.permute.xlu1 %v1760_v48 }
 0x46c   :  { %v900_v39 = vpop.permute.xlu2 %899 }
 0x46d   :  { %v902_v51 = vmul.f32 %v900_v39, %v1799_v10  ;;  %v903_v4 = vmul.f32 %v900_v39, %v1801_v11  ;;  %v904_v47 = vmul.f32 %v900_v39, %v1803_v12 }
 0x475   :  { %v936_v60 = vpop.permute.xlu2 %935 }
 0x476   :  { %v939_v53 = vmul.f32 %v936_v60, %v1849_v43 }
 0x484   :  { %v912_v62 = vpop.permute.xlu0 %911 }
 0x485   :  { %v888_v63 = vpop.permute.xlu1 %887  ;;  %v914_v40 = vmul.f32 %v912_v62, %v1811_v16  ;;  %v915_v34 = vmul.f32 %v912_v62, %v1818_v19  ;;  %v916_v30 = vmul.f32 %v912_v62, %v1820_v20 }
 0x486   :  { %v890_v45 = vmul.f32 %v888_v63, %v1793_v7  ;;  %v891_v33 = vmul.f32 %v888_v63, %v1795_v8  ;;  %v892_v41 = vmul.f32 %v888_v63, %v1797_v9 }
 0x488   :  { %v894_v50 = vadd.f32 %v890_v45, %v881_v59  ;;  %v895_v27 = vadd.f32 %v891_v33, %v882_v58  ;;  %v896_v29 = vadd.f32 %v892_v41, %v883_v31  ;;  %v938_v58 = vmul.f32 %v936_v60, %v1847_v42 }
 0x489   :  { %v940_v31 = vmul.f32 %v936_v60, %v1851_v44 }
 0x48a   :  { %v906_v24 = vadd.f32 %v902_v51, %v894_v50  ;;  %v907_v54 = vadd.f32 %v903_v4, %v895_v27  ;;  %v908_v5 = vadd.f32 %v904_v47, %v896_v29  ;;  %v880_v51 = vmul.f32 %v875_v3, %v1814_v17 }
 0x48b   :  { %v893_v29 = vmul.f32 %v888_v63, %v1862_v57  ;;  %v917_v3 = vmul.f32 %v912_v62, %v1875_v32 }
 0x48c   :  { %v918_v2 = vadd.f32 %v914_v40, %v906_v24  ;;  %v919_v28 = vadd.f32 %v915_v34, %v907_v54  ;;  %v920_v26 = vadd.f32 %v916_v30, %v908_v5  ;;  %v884_v5 = vadd.f32 %v880_v51, %v1855_v49 }
 0x48d   :  { %v905_v34 = vmul.f32 %v900_v39, %v1870_v23 }
 0x48e   :  { %v924_v56 = vpop.permute.xlu1 %923  ;;  %v897_v40 = vadd.f32 %v893_v29, %v884_v5 }
 0x48f   :  { %v926_v55 = vmul.f32 %v924_v56, %v1838_v36  ;;  %v927_v25 = vmul.f32 %v924_v56, %v1840_v37  ;;  %v928_v59 = vmul.f32 %v924_v56, %v1842_v38 }
 0x490   :  { %v909_v30 = vadd.f32 %v905_v34, %v897_v40 }
 0x491   :  { %v930_v45 = vadd.f32 %v926_v55, %v918_v2  ;;  %v931_v33 = vadd.f32 %v927_v25, %v919_v28  ;;  %v932_v41 = vadd.f32 %v928_v59, %v920_v26  ;;  %v929_v26 = vmul.f32 %v924_v56, %v1879_v35 }
 0x492   :  { %v921_v59 = vadd.f32 %v917_v3, %v909_v30 }
 0x493   :  { %v942_v4 = vadd.f32 %v938_v58, %v930_v45  ;;  %v943_v50 = vadd.f32 %v939_v53, %v931_v33  ;;  %v944_v27 = vadd.f32 %v940_v31, %v932_v41  ;;  %v941_v31 = vmul.f32 %v936_v60, %v1883_v46 }
 0x494   :  { %v933_v53 = vadd.f32 %v929_v26, %v921_v59 }
 0x495   :  { %v1468_v47 = vmul.f32 -1.442695, %v942_v4  ;;  %v1469_v24 = vmul.f32 -1.442695, %v943_v50  ;;  %v1470_v54 = vmul.f32 -1.442695, %v944_v27 }
 0x496   :  { %v945_v39 = vadd.f32 %v941_v31, %v933_v53 }
 0x497   :  { %1639 = vpow2.f32 %v1468_v47 }
 0x498   :  { %1641 = vpow2.f32 %v1469_v24 }
 0x499   :  { %1643 = vpow2.f32 %v1470_v54 }
 0x49d   :  { %v1640_v2 = vpop.eup %1639 }
 0x49e   :  { %v1642_v28 = vpop.eup %1641  ;;  %v955_v55 = vadd.f32 1.0, %v1640_v2 }
 0x49f   :  { %v1644_v63 = vpop.eup %1643  ;;  %v956_v25 = vadd.f32 1.0, %v1642_v28 }
 0x4a0   :  { %v957_v58 = vadd.f32 1.0, %v1644_v63  ;;  %1645 = vrcp.f32 %v955_v55  ;;  %v969_v56 = vand.u32 2147483648, %v955_v55  ;;  %v967_v47 = vand.u32 2147483647, %v955_v55 }
 0x4a1   :  { %1647 = vrcp.f32 %v956_v25  ;;  %v984_v24 = vand.u32 2147483648, %v956_v25  ;;  %v982_v5 = vand.u32 2147483647, %v956_v25  ;;  %vm963_vm10 = vweird.f32 %v955_v55 }
 0x4a2   :  { %1649 = vrcp.f32 %v957_v58  ;;  %v970_v34 = vor.u32 1.1754944e-38, %v969_v56  ;;  %vm978_vm12 = vweird.f32 %v956_v25  ;;  %vm968_vm13 = vcmp.eq.f32.partialorder %v967_v47, 8.507059e+37 }
 0x4a3   :  { %1651 = vtanh.f32 %v945_v39  ;;  %v985_v28 = vor.u32 1.1754944e-38, %v984_v24  ;;  %vm983_vm15 = vcmp.eq.f32.partialorder %v982_v5, 8.507059e+37  ;;  %vm993_vm1 = vweird.f32 %v957_v58 }
 0x4a6   :  { %v1646_v45 = vpop.eup %1645 }
 0x4a7   :  { %v1648_v33 = vpop.eup %1647  ;;  %v959_v41 = vmul.f32 %v1646_v45, %v955_v55  ;;  %vm964_vm8 = vweird.f32 %v1646_v45 }
 0x4a8   :  { %v1650_v51 = vpop.eup %1649  ;;  %v974_v4 = vmul.f32 %v1648_v33, %v956_v25  ;;  %vm979_vm9 = vweird.f32 %v1648_v33  ;;  %vm965_vm11 = vmor %vm963_vm10, %vm964_vm8  ;;  %v997_v25 = vand.u32 2147483647, %v957_v58 }
 0x4a9   :  { %v960_v62 = vsub.f32 1.0, %v959_v41  ;;  %v989_v50 = vmul.f32 %v1650_v51, %v957_v58  ;;  %vm980_vm14 = vmor %vm978_vm12, %vm979_vm9  ;;  %v1652_v3 = vpop.eup %1651  ;;  %vm994_vm0 = vweird.f32 %v1650_v51 }
 0x4aa   :  { %v975_v27 = vsub.f32 1.0, %v974_v4  ;;  %v999_v4 = vand.u32 2147483648, %v957_v58  ;;  %vm995_vm2 = vmor %vm993_vm1, %vm994_vm0  ;;  %vm998_vm3 = vcmp.eq.f32.partialorder %v997_v25, 8.507059e+37 }
 0x4ab   :  { %v961_v29 = vmul.f32 %v1646_v45, %v960_v62  ;;  %v990_v60 = vsub.f32 1.0, %v989_v50 }
 0x4ac   :  { %v976_v54 = vmul.f32 %v1648_v33, %v975_v27  ;;  %v1000_v62 = vor.u32 1.1754944e-38, %v999_v4 }
 0x4ad   :  { %v962_v40 = vadd.f32 %v1646_v45, %v961_v29  ;;  %v991_v31 = vmul.f32 %v1650_v51, %v990_v60 }
 0x4ae   :  { %v977_v30 = vadd.f32 %v1648_v33, %v976_v54 }
 0x4af   :  { %v966_v2 = vsel %vm965_vm11, %v1646_v45, %v962_v40  ;;  %v992_v55 = vadd.f32 %v1650_v51, %v991_v31 }
 0x4b0   :  { %v971_v26 = vsel %vm968_vm13, %v970_v34, %v966_v2  ;;  %v981_v63 = vsel %vm980_vm14, %v1648_v33, %v977_v30 }
 0x4b1   :  { %v986_v59 = vsel %vm983_vm15, %v985_v28, %v981_v63  ;;  %v1005_v53 = vmul.f32 %v1652_v3, %v971_v26  ;;  %v996_v45 = vsel %vm995_vm2, %v1650_v51, %v992_v55 }
 0x4b2   :  { %v1004_v39 = vmul.f32 %v986_v59, %v2090_v61  ;;  %v1001_v50 = vsel %vm998_vm3, %v1000_v62, %v996_v45  ;;  %v1012_v61 = vpop.permute.xlu1 %1011 }
 0x4b3   :  { %v1014_v58 = vmul.f32 %v1012_v61, %v1805_v13  ;;  %v1015_v51 = vmul.f32 %v1012_v61, %v1807_v14  ;;  %v1016_v27 = vmul.f32 %v1012_v61, %v1809_v15 }
 0x4b4   :  { %v2131_v41 = vadd.f32 %v1005_v53, %v1004_v39 }
 0x4b5   :  { %v1018_v47 = vadd.f32 %v1014_v58, %v1816_v18  ;;  %v1019_v24 = vadd.f32 %v1015_v51, %v1822_v21  ;;  %v1020_v40 = vadd.f32 %v1016_v27, %v1824_v22 }
 0x4b6   :  { %1653 = vtanh.f32 %v2131_v41 }
 0x4bc   :  { %v1654_v33 = vpop.eup %1653 }
 0x4bd   :  { %v1008_v56 = vmul.f32 %v1654_v33, %v1001_v50 }
 0x4bf   :  { %1048 = vperm.xlu1 %1527, %v1008_v56   ;;  %1036 = vperm.xlu0 %1526, %v1008_v56  }
 0x4c0   :  { %1024 = vperm.xlu2 %1525, %v1008_v56  }
 0x4c7   :  { %1529 = vset.pattern.permute.xlu1 %v1761_v52  ;;  %1531 = vset.pattern.permute.xlu0 %v1759_v0 }
 0x4c8   :  { %1528 = vset.pattern.permute.xlu2 %v1762_v1  ;;  %1072 = vperm.xlu1 %1529, %v1008_v56  }
 0x4c9   :  { %1060 = vperm.xlu2 %1528, %v1008_v56  }
 0x4d0   :  { %1532 = vset.pattern.permute.xlu1 %v1763_v6 }
 0x4d1   :  { %1530 = vset.pattern.permute.xlu2 %v1759_v0 }
 0x51a   :  { %v1025_v29 = vpop.permute.xlu2 %1024 }
 0x51b   :  { %v1027_v54 = vmul.f32 %v1025_v29, %v1793_v7  ;;  %v1028_v5 = vmul.f32 %v1025_v29, %v1795_v8  ;;  %v1029_v60 = vmul.f32 %v1025_v29, %v1797_v9 }
 0x51d   :  { %v1031_v34 = vadd.f32 %v1027_v54, %v1018_v47  ;;  %v1032_v30 = vadd.f32 %v1028_v5, %v1019_v24  ;;  %v1033_v3 = vadd.f32 %v1029_v60, %v1020_v40 }
 0x523   :  { %v1061_v25 = vpop.permute.xlu2 %1060 }
 0x524   :  { %v1063_v56 = vmul.f32 %v1061_v25, %v1838_v36  ;;  %v1064_v58 = vmul.f32 %v1061_v25, %v1840_v37  ;;  %v1065_v51 = vmul.f32 %v1061_v25, %v1842_v38 }
 0x531   :  { %v1037_v2 = vpop.permute.xlu0 %1036  ;;  %v1049_v28 = vpop.permute.xlu1 %1048 }
 0x532   :  { %v1039_v26 = vmul.f32 %v1037_v2, %v1799_v10  ;;  %v1040_v63 = vmul.f32 %v1037_v2, %v1801_v11  ;;  %v1041_v59 = vmul.f32 %v1037_v2, %v1803_v12  ;;  %v1051_v53 = vmul.f32 %v1049_v28, %v1811_v16 }
 0x533   :  { %v1052_v4 = vmul.f32 %v1049_v28, %v1818_v19  ;;  %v1053_v45 = vmul.f32 %v1049_v28, %v1820_v20 }
 0x534   :  { %v1043_v31 = vadd.f32 %v1039_v26, %v1031_v34  ;;  %v1044_v39 = vadd.f32 %v1040_v63, %v1032_v30  ;;  %v1045_v55 = vadd.f32 %v1041_v59, %v1033_v3  ;;  %v1017_v34 = vmul.f32 %v1012_v61, %v1814_v17  ;;  %v36_v63 = vld [vmem:[%s2250_s0 + $0x20] sm:$0xf] }
 0x535   :  { %1148 = vperm.xlu2 %1530, %v36_v63  }
 0x536   :  { %v1055_v62 = vadd.f32 %v1051_v53, %v1043_v31  ;;  %v1056_v33 = vadd.f32 %v1052_v4, %v1044_v39  ;;  %v1057_v50 = vadd.f32 %v1053_v45, %v1045_v55  ;;  %v1021_v39 = vadd.f32 %v1017_v34, %v1855_v49 }
 0x537   :  { %v1030_v55 = vmul.f32 %v1025_v29, %v1862_v57  ;;  %v1042_v4 = vmul.f32 %v1037_v2, %v1870_v23  ;;  %v1066_v29 = vmul.f32 %v1061_v25, %v1879_v35 }
 0x538   :  { %v1067_v27 = vadd.f32 %v1063_v56, %v1055_v62  ;;  %v1068_v47 = vadd.f32 %v1064_v58, %v1056_v33  ;;  %v1069_v54 = vadd.f32 %v1065_v51, %v1057_v50  ;;  %v1054_v50 = vmul.f32 %v1049_v28, %v1875_v32 }
 0x539   :  { %v1034_v61 = vadd.f32 %v1030_v55, %v1021_v39 }
 0x53a   :  { %v1073_v24 = vpop.permute.xlu1 %1072 }
 0x53b   :  { %v1075_v5 = vmul.f32 %v1073_v24, %v1847_v42  ;;  %v1076_v40 = vmul.f32 %v1073_v24, %v1849_v43  ;;  %v1077_v60 = vmul.f32 %v1073_v24, %v1851_v44  ;;  %v1046_v45 = vadd.f32 %v1042_v4, %v1034_v61 }
 0x53c   :  { %v1078_v2 = vmul.f32 %v1073_v24, %v1883_v46 }
 0x53d   :  { %v1079_v30 = vadd.f32 %v1075_v5, %v1067_v27  ;;  %v1080_v3 = vadd.f32 %v1076_v40, %v1068_v47  ;;  %v1081_v26 = vadd.f32 %v1077_v60, %v1069_v54  ;;  %1533 = vset.pattern.permute.xlu2 %v1760_v48  ;;  %v1058_v27 = vadd.f32 %v1054_v50, %v1046_v45 }
 0x53f   :  { %v1471_v59 = vmul.f32 -1.442695, %v1079_v30  ;;  %v1472_v53 = vmul.f32 -1.442695, %v1080_v3  ;;  %v1473_v31 = vmul.f32 -1.442695, %v1081_v26  ;;  %v1070_v54 = vadd.f32 %v1066_v29, %v1058_v27 }
 0x541   :  { %1655 = vpow2.f32 %v1471_v59  ;;  %v1082_v40 = vadd.f32 %v1078_v2, %v1070_v54 }
 0x542   :  { %1657 = vpow2.f32 %v1472_v53 }
 0x543   :  { %1659 = vpow2.f32 %v1473_v31 }
 0x547   :  { %v1656_v62 = vpop.eup %1655 }
 0x548   :  { %v1658_v33 = vpop.eup %1657  ;;  %v1092_v56 = vadd.f32 1.0, %v1656_v62 }
 0x549   :  { %v1660_v58 = vpop.eup %1659  ;;  %v1093_v51 = vadd.f32 1.0, %v1658_v33 }
 0x54a   :  { %v1094_v47 = vadd.f32 1.0, %v1660_v58  ;;  %1661 = vrcp.f32 %v1092_v56  ;;  %v1106_v63 = vand.u32 2147483648, %v1092_v56  ;;  %v1104_v31 = vand.u32 2147483647, %v1092_v56 }
 0x54b   :  { %1663 = vrcp.f32 %v1093_v51  ;;  %v1121_v39 = vand.u32 2147483648, %v1093_v51  ;;  %v1119_v24 = vand.u32 2147483647, %v1093_v51  ;;  %vm1100_vm6 = vweird.f32 %v1092_v56 }
 0x54c   :  { %1665 = vrcp.f32 %v1094_v47  ;;  %v1107_v61 = vor.u32 1.1754944e-38, %v1106_v63  ;;  %vm1115_vm8 = vweird.f32 %v1093_v51  ;;  %vm1105_vm9 = vcmp.eq.f32.partialorder %v1104_v31, 8.507059e+37 }
 0x54d   :  { %1667 = vtanh.f32 %v1082_v40  ;;  %v1122_v33 = vor.u32 1.1754944e-38, %v1121_v39  ;;  %vm1120_vm11 = vcmp.eq.f32.partialorder %v1119_v24, 8.507059e+37  ;;  %vm1130_vm13 = vweird.f32 %v1094_v47 }
 0x550   :  { %v1662_v5 = vpop.eup %1661 }
 0x551   :  { %v1664_v60 = vpop.eup %1663  ;;  %v1096_v34 = vmul.f32 %v1662_v5, %v1092_v56  ;;  %vm1101_vm4 = vweird.f32 %v1662_v5 }
 0x552   :  { %v1666_v30 = vpop.eup %1665  ;;  %v1111_v3 = vmul.f32 %v1664_v60, %v1093_v51  ;;  %vm1116_vm5 = vweird.f32 %v1664_v60  ;;  %vm1102_vm7 = vmor %vm1100_vm6, %vm1101_vm4  ;;  %v1134_v51 = vand.u32 2147483647, %v1094_v47 }
 0x553   :  { %v1097_v28 = vsub.f32 1.0, %v1096_v34  ;;  %v1126_v26 = vmul.f32 %v1666_v30, %v1094_v47  ;;  %vm1117_vm10 = vmor %vm1115_vm8, %vm1116_vm5  ;;  %v1668_v50 = vpop.eup %1667  ;;  %vm1131_vm12 = vweird.f32 %v1666_v30 }
 0x554   :  { %v1112_v59 = vsub.f32 1.0, %v1111_v3  ;;  %v1136_v3 = vand.u32 2147483648, %v1094_v47  ;;  %vm1132_vm14 = vmor %vm1130_vm13, %vm1131_vm12  ;;  %vm1135_vm15 = vcmp.eq.f32.partialorder %v1134_v51, 8.507059e+37 }
 0x555   :  { %v1098_v53 = vmul.f32 %v1662_v5, %v1097_v28  ;;  %v1127_v4 = vsub.f32 1.0, %v1126_v26 }
 0x556   :  { %v1113_v25 = vmul.f32 %v1664_v60, %v1112_v59  ;;  %v1137_v28 = vor.u32 1.1754944e-38, %v1136_v3 }
 0x557   :  { %v1099_v55 = vadd.f32 %v1662_v5, %v1098_v53  ;;  %v1128_v54 = vmul.f32 %v1666_v30, %v1127_v4 }
 0x558   :  { %v1114_v45 = vadd.f32 %v1664_v60, %v1113_v25 }
 0x559   :  { %v1103_v62 = vsel %vm1102_vm7, %v1662_v5, %v1099_v55  ;;  %v1129_v56 = vadd.f32 %v1666_v30, %v1128_v54 }
 0x55a   :  { %v1108_v58 = vsel %vm1105_vm9, %v1107_v61, %v1103_v62  ;;  %v1118_v27 = vsel %vm1117_vm10, %v1664_v60, %v1114_v45 }
 0x55b   :  { %v1123_v29 = vsel %vm1120_vm11, %v1122_v33, %v1118_v27  ;;  %v1142_v2 = vmul.f32 %v1668_v50, %v1108_v58  ;;  %v1133_v5 = vsel %vm1132_vm14, %v1666_v30, %v1129_v56 }
 0x55c   :  { %v1141_v40 = vmul.f32 %v1123_v29, %v2131_v41  ;;  %v1138_v26 = vsel %vm1135_vm15, %v1137_v28, %v1133_v5  ;;  %v37_v41 = vld [vmem:[%s2250_s0 + $0x24] sm:$0xf]  ;;  %s1764_s0 = smov [#allocation5]  }
 0x55d   :  { %s1438_s7 = sshll.u32 %s1764_s0, 4  ;;  %s1439_s7 = int_to_ptr.vmem [resolvable:$true] %s1438_s7 }
 0x55e   :  { %v2172_v34 = vadd.f32 %v1142_v2, %v1141_v40 }
 0x560   :  { %1669 = vtanh.f32 %v2172_v34 }
 0x566   :  { %v1670_v60 = vpop.eup %1669 }
 0x567   :  { %v1145_v63 = vmul.f32 %v1670_v60, %v1138_v26 }
 0x569   :  { %1185 = vperm.xlu2 %1533, %v1145_v63   ;;  %1173 = vperm.xlu1 %1532, %v1145_v63  }
 0x56a   :  { %1161 = vperm.xlu0 %1531, %v1145_v63  }
 0x571   :  { %1535 = vset.pattern.permute.xlu2 %v1761_v52  ;;  %1534 = vset.pattern.permute.xlu1 %v1762_v1 }
 0x572   :  { %1285 = vperm.xlu0 %1531, %v37_v41   ;;  %1209 = vperm.xlu2 %1535, %v1145_v63  }
 0x573   :  { %1197 = vperm.xlu1 %1534, %v1145_v63  }
 0x57a   :  { %1537 = vset.pattern.permute.xlu2 %v1763_v6  ;;  %1538 = vset.pattern.permute.xlu0 %v1760_v48 }
 0x57b   :  { %1536 = vset.pattern.permute.xlu1 %v1759_v0 }
 0x58f   :  { %v1149_v47 = vpop.permute.xlu2 %1148 }
 0x590   :  { %v1151_v30 = vmul.f32 %v1149_v47, %v1805_v13  ;;  %v1152_v59 = vmul.f32 %v1149_v47, %v1807_v14  ;;  %v1153_v53 = vmul.f32 %v1149_v47, %v1809_v15 }
 0x592   :  { %v1155_v25 = vadd.f32 %v1151_v30, %v1816_v18  ;;  %v1156_v24 = vadd.f32 %v1152_v59, %v1822_v21  ;;  %v1157_v6 = vadd.f32 %v1153_v53, %v1824_v22 }
 0x5c3   :  { %v1186_v31 = vpop.permute.xlu2 %1185 }
 0x5c4   :  { %v1188_v54 = vmul.f32 %v1186_v31, %v1811_v16  ;;  %v1189_v40 = vmul.f32 %v1186_v31, %v1818_v19  ;;  %v1190_v56 = vmul.f32 %v1186_v31, %v1820_v20 }
 0x5cc   :  { %v1210_v3 = vpop.permute.xlu2 %1209 }
 0x5cd   :  { %v1212_v30 = vmul.f32 %v1210_v3, %v1847_v42  ;;  %v1213_v59 = vmul.f32 %v1210_v3, %v1849_v43  ;;  %v1214_v53 = vmul.f32 %v1210_v3, %v1851_v44 }
 0x5db   :  { %v1174_v39 = vpop.permute.xlu1 %1173 }
 0x5dc   :  { %v1162_v55 = vpop.permute.xlu0 %1161  ;;  %v1176_v61 = vmul.f32 %v1174_v39, %v1799_v10  ;;  %v1177_v45 = vmul.f32 %v1174_v39, %v1801_v11  ;;  %v1178_v58 = vmul.f32 %v1174_v39, %v1803_v12 }
 0x5dd   :  { %v1164_v48 = vmul.f32 %v1162_v55, %v1793_v7  ;;  %v1165_v0 = vmul.f32 %v1162_v55, %v1795_v8  ;;  %v1166_v4 = vmul.f32 %v1162_v55, %v1797_v9 }
 0x5df   :  { %v1168_v62 = vadd.f32 %v1164_v48, %v1155_v25  ;;  %v1169_v33 = vadd.f32 %v1165_v0, %v1156_v24  ;;  %v1170_v50 = vadd.f32 %v1166_v4, %v1157_v6  ;;  %v1154_v48 = vmul.f32 %v1149_v47, %v1814_v17 }
 0x5e0   :  { %v1191_v47 = vmul.f32 %v1186_v31, %v1875_v32 }
 0x5e1   :  { %v1180_v27 = vadd.f32 %v1176_v61, %v1168_v62  ;;  %v1181_v29 = vadd.f32 %v1177_v45, %v1169_v33  ;;  %v1182_v2 = vadd.f32 %v1178_v58, %v1170_v50  ;;  %v1167_v45 = vmul.f32 %v1162_v55, %v1862_v57 }
 0x5e2   :  { %v1158_v58 = vadd.f32 %v1154_v48, %v1855_v49 }
 0x5e3   :  { %v1192_v5 = vadd.f32 %v1188_v54, %v1180_v27  ;;  %v1193_v28 = vadd.f32 %v1189_v40, %v1181_v29  ;;  %v1194_v60 = vadd.f32 %v1190_v56, %v1182_v2  ;;  %v1179_v29 = vmul.f32 %v1174_v39, %v1870_v23 }
 0x5e4   :  { %v1171_v27 = vadd.f32 %v1167_v45, %v1158_v58 }
 0x5e5   :  { %v1198_v51 = vpop.permute.xlu1 %1197 }
 0x5e6   :  { %v1200_v26 = vmul.f32 %v1198_v51, %v1838_v36  ;;  %v1201_v63 = vmul.f32 %v1198_v51, %v1840_v37  ;;  %v1202_v41 = vmul.f32 %v1198_v51, %v1842_v38  ;;  %v1183_v2 = vadd.f32 %v1179_v29, %v1171_v27 }
 0x5e7   :  { %v1203_v56 = vmul.f32 %v1198_v51, %v1879_v35 }
 0x5e8   :  { %v1204_v25 = vadd.f32 %v1200_v26, %v1192_v5  ;;  %v1205_v24 = vadd.f32 %v1201_v63, %v1193_v28  ;;  %v1206_v6 = vadd.f32 %v1202_v41, %v1194_v60  ;;  %v1195_v60 = vadd.f32 %v1191_v47, %v1183_v2 }
 0x5e9   :  { %v1215_v41 = vmul.f32 %v1210_v3, %v1883_v46 }
 0x5ea   :  { %v1216_v0 = vadd.f32 %v1212_v30, %v1204_v25  ;;  %v1217_v4 = vadd.f32 %v1213_v59, %v1205_v24  ;;  %v1218_v61 = vadd.f32 %v1214_v53, %v1206_v6  ;;  %v1207_v63 = vadd.f32 %v1203_v56, %v1195_v60 }
 0x5ec   :  { %v1474_v62 = vmul.f32 -1.442695, %v1216_v0  ;;  %v1475_v33 = vmul.f32 -1.442695, %v1217_v4  ;;  %v1476_v50 = vmul.f32 -1.442695, %v1218_v61  ;;  %v1219_v39 = vadd.f32 %v1215_v41, %v1207_v63 }
 0x5ee   :  { %1671 = vpow2.f32 %v1474_v62 }
 0x5ef   :  { %1673 = vpow2.f32 %v1475_v33 }
 0x5f0   :  { %1675 = vpow2.f32 %v1476_v50 }
 0x5f4   :  { %v1672_v54 = vpop.eup %1671 }
 0x5f5   :  { %v1674_v40 = vpop.eup %1673  ;;  %v1229_v5 = vadd.f32 1.0, %v1672_v54 }
 0x5f6   :  { %v1676_v55 = vpop.eup %1675  ;;  %v1230_v28 = vadd.f32 1.0, %v1674_v40 }
 0x5f7   :  { %v1231_v26 = vadd.f32 1.0, %v1676_v55  ;;  %1677 = vrcp.f32 %v1229_v5  ;;  %v1243_v51 = vand.u32 2147483648, %v1229_v5  ;;  %v1241_v4 = vand.u32 2147483647, %v1229_v5 }
 0x5f8   :  { %1679 = vrcp.f32 %v1230_v28  ;;  %v1258_v61 = vand.u32 2147483648, %v1230_v28  ;;  %v1256_v62 = vand.u32 2147483647, %v1230_v28  ;;  %vm1237_vm2 = vweird.f32 %v1229_v5 }
 0x5f9   :  { %1681 = vrcp.f32 %v1231_v26  ;;  %v1244_v50 = vor.u32 1.1754944e-38, %v1243_v51  ;;  %vm1252_vm4 = vweird.f32 %v1230_v28  ;;  %vm1242_vm5 = vcmp.eq.f32.partialorder %v1241_v4, 8.507059e+37 }
 0x5fa   :  { %1683 = vtanh.f32 %v1219_v39  ;;  %v1259_v29 = vor.u32 1.1754944e-38, %v1258_v61  ;;  %vm1257_vm7 = vcmp.eq.f32.partialorder %v1256_v62, 8.507059e+37  ;;  %v1273_v41 = vand.u32 2147483648, %v1231_v26 }
 0x5fb   :  { %vm1267_vm9 = vweird.f32 %v1231_v26 }
 0x5fc   :  { %v1274_v39 = vor.u32 1.1754944e-38, %v1273_v41 }
 0x5fd   :  { %v1678_v30 = vpop.eup %1677 }
 0x5fe   :  { %v1680_v59 = vpop.eup %1679  ;;  %v1233_v53 = vmul.f32 %v1678_v30, %v1229_v5  ;;  %vm1238_vm0 = vweird.f32 %v1678_v30 }
 0x5ff   :  { %v1682_v25 = vpop.eup %1681  ;;  %v1248_v24 = vmul.f32 %v1680_v59, %v1230_v28  ;;  %vm1253_vm1 = vweird.f32 %v1680_v59  ;;  %vm1239_vm3 = vmor %vm1237_vm2, %vm1238_vm0  ;;  %v1271_v28 = vand.u32 2147483647, %v1231_v26 }
 0x600   :  { %v1234_v31 = vsub.f32 1.0, %v1233_v53  ;;  %v1263_v6 = vmul.f32 %v1682_v25, %v1231_v26  ;;  %vm1254_vm6 = vmor %vm1252_vm4, %vm1253_vm1  ;;  %v1684_v2 = vpop.eup %1683  ;;  %vm1268_vm8 = vweird.f32 %v1682_v25 }
 0x601   :  { %v1249_v48 = vsub.f32 1.0, %v1248_v24  ;;  %vm1269_vm10 = vmor %vm1267_vm9, %vm1268_vm8  ;;  %vm1272_vm11 = vcmp.eq.f32.partialorder %v1271_v28, 8.507059e+37  ;;  %vm1424_vm8 = vcmask 1043456  }
 0x602   :  { %v1235_v0 = vmul.f32 %v1678_v30, %v1234_v31  ;;  %v1264_v3 = vsub.f32 1.0, %v1263_v6 }
 0x603   :  { %v1250_v45 = vmul.f32 %v1680_v59, %v1249_v48 }
 0x604   :  { %v1236_v33 = vadd.f32 %v1678_v30, %v1235_v0  ;;  %v1265_v55 = vmul.f32 %v1682_v25, %v1264_v3 }
 0x605   :  { %v1251_v58 = vadd.f32 %v1680_v59, %v1250_v45 }
 0x606   :  { %v1240_v27 = vsel %vm1239_vm3, %v1678_v30, %v1236_v33  ;;  %v1266_v5 = vadd.f32 %v1682_v25, %v1265_v55 }
 0x607   :  { %v1245_v54 = vsel %vm1242_vm5, %v1244_v50, %v1240_v27  ;;  %v1255_v40 = vsel %vm1254_vm6, %v1680_v59, %v1251_v58 }
 0x608   :  { %v1260_v47 = vsel %vm1257_vm7, %v1259_v29, %v1255_v40  ;;  %v1279_v56 = vmul.f32 %v1684_v2, %v1245_v54  ;;  %v1270_v30 = vsel %vm1269_vm10, %v1682_v25, %v1266_v5 }
 0x609   :  { %v1278_v60 = vmul.f32 %v1260_v47, %v2172_v34  ;;  %v1275_v53 = vsel %vm1272_vm11, %v1274_v39, %v1270_v30  ;;  %v1286_v34 = vpop.permute.xlu0 %1285 }
 0x60a   :  { %v1288_v26 = vmul.f32 %v1286_v34, %v1805_v13  ;;  %v1289_v25 = vmul.f32 %v1286_v34, %v1807_v14  ;;  %v1290_v31 = vmul.f32 %v1286_v34, %v1809_v15 }
 0x60b   :  { %v2212_v63 = vadd.f32 %v1279_v56, %v1278_v60 }
 0x60c   :  { %v1292_v51 = vadd.f32 %v1288_v26, %v1816_v18  ;;  %v1293_v48 = vadd.f32 %v1289_v25, %v1822_v21  ;;  %v1294_v4 = vadd.f32 %v1290_v31, %v1824_v22 }
 0x60d   :  { %1685 = vtanh.f32 %v2212_v63 }
 0x613   :  { %v1686_v59 = vpop.eup %1685 }
 0x614   :  { %v1282_v24 = vmul.f32 %v1686_v59, %v1275_v53 }
 0x616   :  { %1322 = vperm.xlu0 %1538, %v1282_v24   ;;  %1310 = vperm.xlu2 %1537, %v1282_v24  }
 0x617   :  { %1298 = vperm.xlu1 %1536, %v1282_v24  }
 0x61e   :  { %1540 = vset.pattern.permute.xlu2 %v1761_v52  ;;  %1541 = vset.pattern.permute.xlu0 %v1761_v52 }
 0x61f   :  { %1539 = vset.pattern.permute.xlu1 %v1762_v1  ;;  %1346 = vperm.xlu2 %1540, %v1282_v24  }
 0x620   :  { %1334 = vperm.xlu1 %1539, %v1282_v24  }
 0x670   :  { %v1311_v6 = vpop.permute.xlu2 %1310 }
 0x671   :  { %v1313_v13 = vmul.f32 %v1311_v6, %v1799_v10  ;;  %v1314_v14 = vmul.f32 %v1311_v6, %v1801_v11  ;;  %v1315_v18 = vmul.f32 %v1311_v6, %v1803_v12 }
 0x688   :  { %v1323_v33 = vpop.permute.xlu0 %1322 }
 0x689   :  { %v1299_v0 = vpop.permute.xlu1 %1298  ;;  %v1325_v22 = vmul.f32 %v1323_v33, %v1811_v16 }
 0x68a   :  { %v1301_v52 = vmul.f32 %v1299_v0, %v1793_v7  ;;  %v1302_v1 = vmul.f32 %v1299_v0, %v1795_v8  ;;  %v1303_v61 = vmul.f32 %v1299_v0, %v1797_v9  ;;  %v1326_v7 = vmul.f32 %v1323_v33, %v1818_v19  ;;  %v1347_v8 = vpop.permute.xlu2 %1346 }
 0x68b   :  { %v1327_v9 = vmul.f32 %v1323_v33, %v1820_v20  ;;  %v1349_v54 = vmul.f32 %v1347_v8, %v1847_v42  ;;  %v1350_v40 = vmul.f32 %v1347_v8, %v1849_v43  ;;  %v1351_v16 = vmul.f32 %v1347_v8, %v1851_v44 }
 0x68c   :  { %v1305_v45 = vadd.f32 %v1301_v52, %v1292_v51  ;;  %v1306_v15 = vadd.f32 %v1302_v1, %v1293_v48  ;;  %v1307_v62 = vadd.f32 %v1303_v61, %v1294_v4  ;;  %v1291_v20 = vmul.f32 %v1286_v34, %v1814_v17 }
 0x68d   :  { %v1316_v43 = vmul.f32 %v1311_v6, %v1870_v23  ;;  %v1328_v17 = vmul.f32 %v1323_v33, %v1875_v32  ;;  %v1352_v25 = vmul.f32 %v1347_v8, %v1883_v46 }
 0x68e   :  { %v1317_v21 = vadd.f32 %v1313_v13, %v1305_v45  ;;  %v1318_v3 = vadd.f32 %v1314_v14, %v1306_v15  ;;  %v1319_v50 = vadd.f32 %v1315_v18, %v1307_v62 }
 0x690   :  { %v1329_v58 = vadd.f32 %v1325_v22, %v1317_v21  ;;  %v1330_v10 = vadd.f32 %v1326_v7, %v1318_v3  ;;  %v1331_v11 = vadd.f32 %v1327_v9, %v1319_v50 }
 0x692   :  { %v1335_v27 = vpop.permute.xlu1 %1334 }
 0x693   :  { %v1337_v29 = vmul.f32 %v1335_v27, %v1838_v36  ;;  %v1338_v2 = vmul.f32 %v1335_v27, %v1840_v37  ;;  %v1339_v12 = vmul.f32 %v1335_v27, %v1842_v38  ;;  %v1304_v36 = vmul.f32 %v1299_v0, %v1862_v57 }
 0x694   :  { %v1295_v38 = vadd.f32 %v1291_v20, %v1855_v49  ;;  %v1340_v59 = vmul.f32 %v1335_v27, %v1879_v35 }
 0x695   :  { %v1341_v19 = vadd.f32 %v1337_v29, %v1329_v58  ;;  %v1342_v47 = vadd.f32 %v1338_v2, %v1330_v10  ;;  %v1343_v56 = vadd.f32 %v1339_v12, %v1331_v11 }
 0x696   :  { %v1308_v42 = vadd.f32 %v1304_v36, %v1295_v38 }
 0x697   :  { %v1353_v55 = vadd.f32 %v1349_v54, %v1341_v19  ;;  %v1354_v60 = vadd.f32 %v1350_v40, %v1342_v47  ;;  %v1355_v5 = vadd.f32 %v1351_v16, %v1343_v56  ;;  %v1703_v54 = vld [vmem:[#allocation2] sm:$0xff] }
 0x698   :  { %v1320_v44 = vadd.f32 %v1316_v43, %v1308_v42  ;;  %v1422_v40 = vperm.slane %v1703_v54, 7 }
 0x699   :  { %v1477_v41 = vmul.f32 -1.442695, %v1353_v55  ;;  %v1478_v37 = vmul.f32 -1.442695, %v1354_v60  ;;  %v1479_v28 = vmul.f32 -1.442695, %v1355_v5 }
 0x69a   :  { %v1332_v34 = vadd.f32 %v1328_v17, %v1320_v44  ;;  %v1542_v60 = vld [vmem:[#allocation2 + $0x20] ss:$0 sm:$0xff] }
 0x69b   :  { %1687 = vpow2.f32 %v1477_v41 }
 0x69c   :  { %1689 = vpow2.f32 %v1478_v37  ;;  %v1344_v49 = vadd.f32 %v1340_v59, %v1332_v34 }
 0x69d   :  { %1691 = vpow2.f32 %v1479_v28 }
 0x69e   :  { %v1356_v23 = vadd.f32 %v1352_v25, %v1344_v49 }
 0x6a1   :  { %v1688_v30 = vpop.eup %1687 }
 0x6a2   :  { %v1690_v39 = vpop.eup %1689  ;;  %v1366_v53 = vadd.f32 1.0, %v1688_v30 }
 0x6a3   :  { %v1692_v57 = vpop.eup %1691  ;;  %v1367_v24 = vadd.f32 1.0, %v1690_v39 }
 0x6a4   :  { %v1368_v26 = vadd.f32 1.0, %v1692_v57  ;;  %1693 = vrcp.f32 %v1366_v53  ;;  %v1380_v52 = vand.u32 2147483648, %v1366_v53  ;;  %v1378_v61 = vand.u32 2147483647, %v1366_v53 }
 0x6a5   :  { %1695 = vrcp.f32 %v1367_v24  ;;  %v1395_v13 = vand.u32 2147483648, %v1367_v24  ;;  %v1393_v45 = vand.u32 2147483647, %v1367_v24  ;;  %vm1374_vm14 = vweird.f32 %v1366_v53 }
 0x6a6   :  { %1697 = vrcp.f32 %v1368_v26  ;;  %v1381_v62 = vor.u32 1.1754944e-38, %v1380_v52  ;;  %vm1389_vm0 = vweird.f32 %v1367_v24  ;;  %vm1379_vm1 = vcmp.eq.f32.partialorder %v1378_v61, 8.507059e+37 }
 0x6a7   :  { %1699 = vtanh.f32 %v1356_v23  ;;  %v1396_v21 = vor.u32 1.1754944e-38, %v1395_v13  ;;  %vm1394_vm3 = vcmp.eq.f32.partialorder %v1393_v45, 8.507059e+37  ;;  %v1410_v11 = vand.u32 2147483648, %v1368_v26 }
 0x6a8   :  { %vm1404_vm5 = vweird.f32 %v1368_v26  ;;  %v1408_v29 = vand.u32 2147483647, %v1368_v26 }
 0x6a9   :  { %v1411_v12 = vor.u32 1.1754944e-38, %v1410_v11 }
 0x6aa   :  { %v1694_v31 = vpop.eup %1693  ;;  %vm1409_vm7 = vcmp.eq.f32.partialorder %v1408_v29, 8.507059e+37 }
 0x6ab   :  { %v1696_v6 = vpop.eup %1695  ;;  %v1370_v51 = vmul.f32 %v1694_v31, %v1366_v53  ;;  %vm1375_vm12 = vweird.f32 %v1694_v31 }
 0x6ac   :  { %v1698_v48 = vpop.eup %1697  ;;  %v1385_v0 = vmul.f32 %v1696_v6, %v1367_v24  ;;  %vm1390_vm13 = vweird.f32 %v1696_v6  ;;  %vm1376_vm15 = vmor %vm1374_vm14, %vm1375_vm12 }
 0x6ad   :  { %v1371_v32 = vsub.f32 1.0, %v1370_v51  ;;  %v1400_v4 = vmul.f32 %v1698_v48, %v1368_v26  ;;  %vm1391_vm2 = vmor %vm1389_vm0, %vm1390_vm13  ;;  %v1700_v3 = vpop.eup %1699  ;;  %vm1405_vm4 = vweird.f32 %v1698_v48 }
 0x6ae   :  { %v1386_v35 = vsub.f32 1.0, %v1385_v0  ;;  %vm1406_vm6 = vmor %vm1404_vm5, %vm1405_vm4 }
 0x6af   :  { %v1372_v1 = vmul.f32 %v1694_v31, %v1371_v32  ;;  %v1401_v46 = vsub.f32 1.0, %v1400_v4 }
 0x6b0   :  { %v1387_v14 = vmul.f32 %v1696_v6, %v1386_v35 }
 0x6b1   :  { %v1373_v15 = vadd.f32 %v1694_v31, %v1372_v1  ;;  %v1402_v8 = vmul.f32 %v1698_v48, %v1401_v46 }
 0x6b2   :  { %v1388_v18 = vadd.f32 %v1696_v6, %v1387_v14 }
 0x6b3   :  { %v1377_v33 = vsel %vm1376_vm15, %v1694_v31, %v1373_v15  ;;  %v1403_v27 = vadd.f32 %v1698_v48, %v1402_v8 }
 0x6b4   :  { %v1382_v50 = vsel %vm1379_vm1, %v1381_v62, %v1377_v33  ;;  %v1392_v22 = vsel %vm1391_vm2, %v1696_v6, %v1388_v18 }
 0x6b5   :  { %v1397_v7 = vsel %vm1394_vm3, %v1396_v21, %v1392_v22  ;;  %v1416_v9 = vmul.f32 %v1700_v3, %v1382_v50  ;;  %v1407_v2 = vsel %vm1406_vm6, %v1698_v48, %v1403_v27 }
 0x6b6   :  { %v1415_v58 = vmul.f32 %v1397_v7, %v2212_v63  ;;  %v1412_v19 = vsel %vm1409_vm7, %v1411_v12, %v1407_v2  ;;  %v1420_v63 = vlaneseq }
 0x6b8   :  { %v1417_v10 = vadd.f32 %v1416_v9, %v1415_v58  ;;  %v1421_v55 = vand.u32 127, %v1420_v63 }
 0x6ba   :  { %1701 = vtanh.f32 %v1417_v10  ;;  %vm1428_vm9 = vcmp.eq.s32.totalorder %v1421_v55, 0 }
 0x6c0   :  { %v1702_v16 = vpop.eup %1701 }
 0x6c1   :  { %v1419_v47 = vmul.f32 %v1702_v16, %v1412_v19 }
 0x6c3   :  { %v1423_v56 = vmul.f32 %v1422_v40, %v1419_v47 }
 0x6c5   :  { %v1425_v20 = vsel %vm1424_vm8, %v1423_v56, 0.0 }
 0x6c6   :  { %1426 = vadd.xlane.f32.xlu1 %v1425_v20 }
 0x739   :  { %v1427_v5 = vpop.xlane.xlu1 %1426 }
 0x73a   :  { %v1429_v36 = vsel %vm1428_vm9, %v1427_v5, 0.0 }
 0x73b   :  { %v1431_v41 = vadd.f32 %v1542_v60, %v1429_v36 }
 0x73d   :  { %1432 = vst [vmem:[#allocation5] sm:$0xf] %v1431_v41 }
 0x73e   :  { %1443 = dma.vmem_to_hbm [thread:$0]  %s1439_s7, 64, %s1441_s10, [#allocation4]  }
 0x73f   :  { %1754 = dma.done.wait [#allocation4], 64  }
 0x740   :  { %1755 = vsyncadd [#allocation4], 4294967232 }
 0x741   :  { %1448 = vsyncpa [#allocation3], 1 }
 0x742   :  { %1449 = vsyncpa [#allocation4], 1 }

</bundles_post_ra>
